<compile_context>
chip_gen: v7x
topology: tpu7x:2x2x1
jax: 0.10.0
libtpu: 0.0.40
codegen_flags: <defaults>
</compile_context>

<pallas_src>
import functools

import numpy as np
import jax
import jax.numpy as jnp
from jax import lax
from jax.experimental import pallas as pl
from jax.experimental.pallas import tpu as pltpu


def _transformer_kernel(x_ref, slab_ref, o_ref, *, specs, num_layers,
                        num_heads, depth, d_model):
    f32 = jnp.float32
    H = d_model

    def w(name):
        s, r, c = specs[name]           # static Python ints -> static slices
        return slab_ref[s:s + r, 0:c]

    def layer_norm(t, gamma, beta):
        # Two independent cross-lane reductions (no mean->subtract->square->mean
        # chain); var clamped to avoid f32 cancellation going slightly negative.
        mu = jnp.mean(t, axis=-1, keepdims=True)
        msq = jnp.mean(t * t, axis=-1, keepdims=True)
        var = jnp.maximum(msq - mu * mu, 0.0)
        return (t - mu) * lax.rsqrt(var + 1e-5) * gamma + beta   # PyTorch eps=1e-5

    # Loop-invariant head-column masks (replace width-8 lane slices + concat).
    col = lax.broadcasted_iota(jnp.int32, (1, H), 1)
    head_masks = [(col >= h * depth) & (col < (h + 1) * depth)
                  for h in range(num_heads)]

    # Input projection.  PyTorch's unsqueeze(1)/transpose(0,1) makes the encoder
    # "sequence" axis equal to the batch axis, so the whole encoder runs on this
    # single 2-D (B, H) tile.
    x = jnp.dot(x_ref[...], w("wi"), preferred_element_type=f32) + w("bi")

    for l in range(num_layers):                     # static unroll (num_layers=2)
        # ---------------- Multi-head self-attention ----------------
        # Three separate projections: no lane-offset slicing of a fused QKV.
        # 1/sqrt(depth) is pre-folded into wq/bq on the host side.
        q = jnp.dot(x, w(f"wq{l}"), preferred_element_type=f32) + w(f"bq{l}")
        k = jnp.dot(x, w(f"wk{l}"), preferred_element_type=f32) + w(f"bk{l}")
        v = jnp.dot(x, w(f"wv{l}"), preferred_element_type=f32) + w(f"bv{l}")

        attn_out = jnp.zeros_like(x)
        for h in range(num_heads):                  # static unroll (4 heads)
            m = head_masks[h]
            qh = jnp.where(m, q, 0.0)               # VPU select, not a lane slice
            vh = jnp.where(m, v, 0.0)
            # Masked-q contraction over all H lanes == head-h contraction.
            scores = lax.dot_general(qh, k, (((1,), (1,)), ((), ())),
                                     preferred_element_type=f32)
            scores = scores - jnp.max(scores, axis=-1, keepdims=True)
            p = jnp.exp(scores)
            den = jnp.sum(p, axis=-1, keepdims=True)
            # AV matmul first, normalisation after: the reduce + reciprocal
            # overlap with the MXU push (numerically identical reordering).
            head = jnp.dot(p, vh, preferred_element_type=f32)   # (B, H), head cols only
            attn_out = attn_out + head * pl.reciprocal(den, approx=False)

        attn_out = (jnp.dot(attn_out, w(f"wo{l}"), preferred_element_type=f32)
                    + w(f"bo{l}"))
        x = layer_norm(x + attn_out, w(f"g1{l}"), w(f"be1{l}"))

        # ---------------- Feed-forward ----------------
        h1 = jnp.dot(x, w(f"w1{l}"), preferred_element_type=f32) + w(f"b1{l}")
        h1 = jnp.maximum(h1, 0.0)
        ff = jnp.dot(h1, w(f"w2{l}"), preferred_element_type=f32) + w(f"b2{l}")
        x = layer_norm(x + ff, w(f"g2{l}"), w(f"be2{l}"))

    # Output projection, written exactly once.
    o_ref[...] = jnp.dot(x, w("wout"), preferred_element_type=f32) + w("bout")


def _pack_weight_slab(named_blocks):
    """Pack all weights/biases into one lane-padded f32 slab (single HBM DMA)."""
    specs = {}
    placed = []
    row = 0
    max_c = 0
    for name, arr in named_blocks:
        a = np.asarray(arr, dtype=np.float32)
        if a.ndim == 1:
            a = a.reshape(1, -1)
        r, c = a.shape
        specs[name] = (row, r, c)
        placed.append((a, row))
        row += ((r + 7) // 8) * 8            # 8-sublane aligned block starts
        max_c = max(max_c, c)
    lanes = max(128, ((max_c + 127) // 128) * 128)
    rows = max(8, ((row + 7) // 8) * 8)
    slab = np.zeros((rows, lanes), np.float32)
    for a, start in placed:
        r, c = a.shape
        slab[start:start + r, 0:c] = a
    return jnp.asarray(slab), specs


def transformer_forward(x, params, num_heads):
    """Run the full Transformer forward pass as a single fused Pallas kernel."""
    layers = params["layers"]
    H = params["wi"].shape[0]                # nn.Linear weight is (out, in)
    L = len(layers)
    depth = H // num_heads
    out_dim = params["wout"].shape[0]
    B = x.shape[0]
    inv_sqrt_depth = 1.0 / (depth ** 0.5)

    # --- Host-side weight prep: transpose, fold 1/sqrt(d) into Q, pack slab ---
    blocks = [("wi", params["wi"].T), ("bi", params["bi"])]
    for l, lp in enumerate(layers):
        blocks += [
            (f"wq{l}", lp["wq"].T * inv_sqrt_depth),
            (f"bq{l}", lp["bq"] * inv_sqrt_depth),
            (f"wk{l}", lp["wk"].T), (f"bk{l}", lp["bk"]),
            (f"wv{l}", lp["wv"].T), (f"bv{l}", lp["bv"]),
            (f"wo{l}", lp["wo"].T), (f"bo{l}", lp["bo"]),
            (f"w1{l}", lp["w1"].T), (f"b1{l}", lp["b1"]),
            (f"w2{l}", lp["w2"].T), (f"b2{l}", lp["b2"]),
            (f"g1{l}", lp["g1"]), (f"be1{l}", lp["be1"]),
            (f"g2{l}", lp["g2"]), (f"be2{l}", lp["be2"]),
        ]
    blocks += [("wout", params["wout"].T), ("bout", params["bout"])]
    slab, specs = _pack_weight_slab(blocks)

    kernel = functools.partial(_transformer_kernel, specs=specs, num_layers=L,
                               num_heads=num_heads, depth=depth, d_model=H)

    return pl.pallas_call(
        kernel,
        out_shape=jax.ShapeDtypeStruct((B, out_dim), jnp.float32),
        in_specs=[pl.BlockSpec(memory_space=pltpu.MemorySpace.VMEM),
                  pl.BlockSpec(memory_space=pltpu.MemorySpace.VMEM)],
        out_specs=pl.BlockSpec(memory_space=pltpu.MemorySpace.VMEM),
    )(x.astype(jnp.float32), slab)


def reference_transformer(x, params, num_heads):
    """Pure-JAX reference mirroring the PyTorch Transformer.forward."""
    def linear(t, w, b):
        return jnp.dot(t, w.T) + b

    def layer_norm(t, g, b, eps=1e-5):
        mu = jnp.mean(t, axis=-1, keepdims=True)
        var = jnp.mean((t - mu) ** 2, axis=-1, keepdims=True)
        return (t - mu) / jnp.sqrt(var + eps) * g + b

    def mha(q_in, k_in, v_in, p):
        Bq, S, D = q_in.shape
        depth = D // num_heads

        def split(t):
            return t.reshape(Bq, S, num_heads, depth).transpose(0, 2, 1, 3)

        q = split(linear(q_in, p["wq"], p["bq"]))
        k = split(linear(k_in, p["wk"], p["bk"]))
        v = split(linear(v_in, p["wv"], p["bv"]))
        scores = jnp.einsum("bhqd,bhkd->bhqk", q, k) / jnp.sqrt(jnp.float32(depth))
        attn = jax.nn.softmax(scores, axis=-1)
        out = jnp.einsum("bhqk,bhkd->bhqd", attn, v)
        out = out.transpose(0, 2, 1, 3).reshape(Bq, S, D)
        return linear(out, p["wo"], p["bo"])

    h = linear(x, params["wi"], params["bi"])        # input_layer
    enc = h[None, :, :]                              # unsqueeze(1).transpose(0,1)
    for lp in params["layers"]:
        attn = mha(enc, enc, enc, lp)
        enc = layer_norm(enc + attn, lp["g1"], lp["be1"])
        ff = linear(jax.nn.relu(linear(enc, lp["w1"], lp["b1"])), lp["w2"], lp["b2"])
        enc = layer_norm(enc + ff, lp["g2"], lp["be2"])
    enc = enc[0, :, :]
    return linear(enc, params["wout"], params["bout"])


if __name__ == "__main__":
    input_dim, hidden_dim, num_heads, num_layers, output_dim = 16, 32, 4, 2, 8
    batch = 8

    key = jax.random.PRNGKey(0)
    keys = iter(jax.random.split(key, 40))

    def dense(kk, out_f, in_f, scale=0.05):
        kw, kb = jax.random.split(kk)
        return (jax.random.normal(kw, (out_f, in_f), jnp.float32) * scale,
                jax.random.normal(kb, (out_f,), jnp.float32) * scale)

    params = {}
    params["wi"], params["bi"] = dense(next(keys), hidden_dim, input_dim)
    params["layers"] = []
    for _ in range(num_layers):
        lp = {}
        lp["wq"], lp["bq"] = dense(next(keys), hidden_dim, hidden_dim)
        lp["wk"], lp["bk"] = dense(next(keys), hidden_dim, hidden_dim)
        lp["wv"], lp["bv"] = dense(next(keys), hidden_dim, hidden_dim)
        lp["wo"], lp["bo"] = dense(next(keys), hidden_dim, hidden_dim)
        lp["w1"], lp["b1"] = dense(next(keys), 4 * hidden_dim, hidden_dim)
        lp["w2"], lp["b2"] = dense(next(keys), hidden_dim, 4 * hidden_dim)
        lp["g1"] = 1.0 + 0.1 * jax.random.normal(next(keys), (hidden_dim,), jnp.float32)
        lp["be1"] = 0.1 * jax.random.normal(next(keys), (hidden_dim,), jnp.float32)
        lp["g2"] = 1.0 + 0.1 * jax.random.normal(next(keys), (hidden_dim,), jnp.float32)
        lp["be2"] = 0.1 * jax.random.normal(next(keys), (hidden_dim,), jnp.float32)
        params["layers"].append(lp)
    params["wout"], params["bout"] = dense(next(keys), output_dim, hidden_dim)

    x = jax.random.normal(next(keys), (batch, input_dim), jnp.float32)

    out = transformer_forward(x, params, num_heads)
    out = jax.block_until_ready(out)

    ref = reference_transformer(x, params, num_heads)
    assert out.shape == (batch, output_dim)
    # Exact reciprocal (approx=False) -> near-exact f32 agreement.
    assert jnp.allclose(out, ref, atol=1e-4, rtol=1e-4), "mismatch vs reference"

    print("KERNEL_OK")
</pallas_src>

<mosaic_0001>
module attributes {stable_mosaic.version = 11 : i64} {
  func.func @_transformer_kernel(%arg0: memref<8x16xf32, #tpu.memory_space<vmem>>, %arg1: memref<800x128xf32, #tpu.memory_space<vmem>>, %arg2: memref<8x8xf32, #tpu.memory_space<vmem>>) attributes {dimension_semantics = [], scalar_prefetch = 0 : i64, scratch_operands = 0 : i64, tpu.core_type = #tpu.core_type<tc>} {
    %0 = tpu.iota {dimensions = array<i32: 1>} : vector<1x32xi32>
    %c0_i32 = arith.constant 0 : i32
    %1 = vector.broadcast %c0_i32 : i32 to vector<1x32xi32>
    %2 = arith.cmpi sge, %0, %1 : vector<1x32xi32>
    %c8_i32 = arith.constant 8 : i32
    %3 = vector.broadcast %c8_i32 : i32 to vector<1x32xi32>
    %4 = arith.cmpi slt, %0, %3 : vector<1x32xi32>
    %5 = arith.andi %2, %4 : vector<1x32xi1>
    %c8_i32_0 = arith.constant 8 : i32
    %6 = vector.broadcast %c8_i32_0 : i32 to vector<1x32xi32>
    %7 = arith.cmpi sge, %0, %6 : vector<1x32xi32>
    %c16_i32 = arith.constant 16 : i32
    %8 = vector.broadcast %c16_i32 : i32 to vector<1x32xi32>
    %9 = arith.cmpi slt, %0, %8 : vector<1x32xi32>
    %10 = arith.andi %7, %9 : vector<1x32xi1>
    %c16_i32_1 = arith.constant 16 : i32
    %11 = vector.broadcast %c16_i32_1 : i32 to vector<1x32xi32>
    %12 = arith.cmpi sge, %0, %11 : vector<1x32xi32>
    %c24_i32 = arith.constant 24 : i32
    %13 = vector.broadcast %c24_i32 : i32 to vector<1x32xi32>
    %14 = arith.cmpi slt, %0, %13 : vector<1x32xi32>
    %15 = arith.andi %12, %14 : vector<1x32xi1>
    %c24_i32_2 = arith.constant 24 : i32
    %16 = vector.broadcast %c24_i32_2 : i32 to vector<1x32xi32>
    %17 = arith.cmpi sge, %0, %16 : vector<1x32xi32>
    %c32_i32 = arith.constant 32 : i32
    %18 = vector.broadcast %c32_i32 : i32 to vector<1x32xi32>
    %19 = arith.cmpi slt, %0, %18 : vector<1x32xi32>
    %20 = arith.andi %17, %19 : vector<1x32xi1>
    %c0 = arith.constant 0 : index
    %c0_3 = arith.constant 0 : index
    %21 = vector.load %arg0[%c0, %c0_3] : memref<8x16xf32, #tpu.memory_space<vmem>>, vector<8x16xf32>
    %c0_4 = arith.constant 0 : index
    %c0_5 = arith.constant 0 : index
    %22 = vector.load %arg1[%c0_4, %c0_5] : memref<800x128xf32, #tpu.memory_space<vmem>>, vector<16x32xf32>
    %cst = arith.constant dense<0.000000e+00> : vector<8x32xf32>
    %23 = tpu.matmul %21, %22, %cst {dimension_numbers = #tpu.dot_dimension_numbers<[1], [0], [0], [1], [0, 0, 1, 1], [], []>} : vector<8x16xf32>, vector<16x32xf32>, vector<8x32xf32> -> vector<8x32xf32>
    %c16 = arith.constant 16 : index
    %c0_6 = arith.constant 0 : index
    %24 = vector.load %arg1[%c16, %c0_6] : memref<800x128xf32, #tpu.memory_space<vmem>>, vector<1x32xf32>
    %25 = vector.broadcast %24 : vector<1x32xf32> to vector<8x32xf32>
    %26 = arith.addf %23, %25 : vector<8x32xf32>
    %c24 = arith.constant 24 : index
    %c0_7 = arith.constant 0 : index
    %27 = vector.load %arg1[%c24, %c0_7] : memref<800x128xf32, #tpu.memory_space<vmem>>, vector<32x32xf32>
    %cst_8 = arith.constant dense<0.000000e+00> : vector<8x32xf32>
    %28 = tpu.matmul %26, %27, %cst_8 {dimension_numbers = #tpu.dot_dimension_numbers<[1], [0], [0], [1], [0, 0, 1, 1], [], []>} : vector<8x32xf32>, vector<32x32xf32>, vector<8x32xf32> -> vector<8x32xf32>
    %c56 = arith.constant 56 : index
    %c0_9 = arith.constant 0 : index
    %29 = vector.load %arg1[%c56, %c0_9] : memref<800x128xf32, #tpu.memory_space<vmem>>, vector<1x32xf32>
    %30 = vector.broadcast %29 : vector<1x32xf32> to vector<8x32xf32>
    %31 = arith.addf %28, %30 : vector<8x32xf32>
    %c64 = arith.constant 64 : index
    %c0_10 = arith.constant 0 : index
    %32 = vector.load %arg1[%c64, %c0_10] : memref<800x128xf32, #tpu.memory_space<vmem>>, vector<32x32xf32>
    %cst_11 = arith.constant dense<0.000000e+00> : vector<8x32xf32>
    %33 = tpu.matmul %26, %32, %cst_11 {dimension_numbers = #tpu.dot_dimension_numbers<[1], [0], [0], [1], [0, 0, 1, 1], [], []>} : vector<8x32xf32>, vector<32x32xf32>, vector<8x32xf32> -> vector<8x32xf32>
    %c96 = arith.constant 96 : index
    %c0_12 = arith.constant 0 : index
    %34 = vector.load %arg1[%c96, %c0_12] : memref<800x128xf32, #tpu.memory_space<vmem>>, vector<1x32xf32>
    %35 = vector.broadcast %34 : vector<1x32xf32> to vector<8x32xf32>
    %36 = arith.addf %33, %35 : vector<8x32xf32>
    %c104 = arith.constant 104 : index
    %c0_13 = arith.constant 0 : index
    %37 = vector.load %arg1[%c104, %c0_13] : memref<800x128xf32, #tpu.memory_space<vmem>>, vector<32x32xf32>
    %cst_14 = arith.constant dense<0.000000e+00> : vector<8x32xf32>
    %38 = tpu.matmul %26, %37, %cst_14 {dimension_numbers = #tpu.dot_dimension_numbers<[1], [0], [0], [1], [0, 0, 1, 1], [], []>} : vector<8x32xf32>, vector<32x32xf32>, vector<8x32xf32> -> vector<8x32xf32>
    %c136 = arith.constant 136 : index
    %c0_15 = arith.constant 0 : index
    %39 = vector.load %arg1[%c136, %c0_15] : memref<800x128xf32, #tpu.memory_space<vmem>>, vector<1x32xf32>
    %40 = vector.broadcast %39 : vector<1x32xf32> to vector<8x32xf32>
    %41 = arith.addf %38, %40 : vector<8x32xf32>
    %cst_16 = arith.constant 0.000000e+00 : f32
    %42 = vector.broadcast %cst_16 : f32 to vector<8x32xf32>
    %cst_17 = arith.constant 0.000000e+00 : f32
    %43 = vector.shape_cast %5 : vector<1x32xi1> to vector<1x32xi1>
    %44 = vector.broadcast %43 : vector<1x32xi1> to vector<8x32xi1>
    %45 = vector.broadcast %cst_17 : f32 to vector<8x32xf32>
    %46 = arith.select %44, %31, %45 : vector<8x32xi1>, vector<8x32xf32>
    %cst_18 = arith.constant 0.000000e+00 : f32
    %47 = vector.shape_cast %5 : vector<1x32xi1> to vector<1x32xi1>
    %48 = vector.broadcast %47 : vector<1x32xi1> to vector<8x32xi1>
    %49 = vector.broadcast %cst_18 : f32 to vector<8x32xf32>
    %50 = arith.select %48, %41, %49 : vector<8x32xi1>, vector<8x32xf32>
    %cst_19 = arith.constant dense<0.000000e+00> : vector<8x8xf32>
    %51 = tpu.matmul %46, %36, %cst_19 {dimension_numbers = #tpu.dot_dimension_numbers<[1], [1], [0], [0], [0, 0, 1, 0], [], []>} : vector<8x32xf32>, vector<8x32xf32>, vector<8x8xf32> -> vector<8x8xf32>
    %cst_20 = arith.constant dense<0xFF800000> : vector<8xf32>
    %52 = vector.multi_reduction <maximumf>, %51, %cst_20 [1] : vector<8x8xf32> to vector<8xf32>
    %53 = vector.shape_cast %52 : vector<8xf32> to vector<8x1xf32>
    %54 = vector.broadcast %53 : vector<8x1xf32> to vector<8x8xf32>
    %55 = arith.subf %51, %54 : vector<8x8xf32>
    %56 = math.exp %55 : vector<8x8xf32>
    %cst_21 = arith.constant dense<0.000000e+00> : vector<8xf32>
    %57 = vector.multi_reduction <add>, %56, %cst_21 [1] : vector<8x8xf32> to vector<8xf32>
    %58 = vector.shape_cast %57 : vector<8xf32> to vector<8x1xf32>
    %cst_22 = arith.constant dense<0.000000e+00> : vector<8x32xf32>
    %59 = tpu.matmul %56, %50, %cst_22 {dimension_numbers = #tpu.dot_dimension_numbers<[1], [0], [0], [1], [0, 0, 1, 1], [], []>} : vector<8x8xf32>, vector<8x32xf32>, vector<8x32xf32> -> vector<8x32xf32>
    %60 = tpu.reciprocal %58 : vector<8x1xf32> -> vector<8x1xf32>
    %61 = vector.broadcast %60 : vector<8x1xf32> to vector<8x32xf32>
    %62 = arith.mulf %59, %61 : vector<8x32xf32>
    %63 = arith.addf %42, %62 : vector<8x32xf32>
    %cst_23 = arith.constant 0.000000e+00 : f32
    %64 = vector.shape_cast %10 : vector<1x32xi1> to vector<1x32xi1>
    %65 = vector.broadcast %64 : vector<1x32xi1> to vector<8x32xi1>
    %66 = vector.broadcast %cst_23 : f32 to vector<8x32xf32>
    %67 = arith.select %65, %31, %66 : vector<8x32xi1>, vector<8x32xf32>
    %cst_24 = arith.constant 0.000000e+00 : f32
    %68 = vector.shape_cast %10 : vector<1x32xi1> to vector<1x32xi1>
    %69 = vector.broadcast %68 : vector<1x32xi1> to vector<8x32xi1>
    %70 = vector.broadcast %cst_24 : f32 to vector<8x32xf32>
    %71 = arith.select %69, %41, %70 : vector<8x32xi1>, vector<8x32xf32>
    %cst_25 = arith.constant dense<0.000000e+00> : vector<8x8xf32>
    %72 = tpu.matmul %67, %36, %cst_25 {dimension_numbers = #tpu.dot_dimension_numbers<[1], [1], [0], [0], [0, 0, 1, 0], [], []>} : vector<8x32xf32>, vector<8x32xf32>, vector<8x8xf32> -> vector<8x8xf32>
    %cst_26 = arith.constant dense<0xFF800000> : vector<8xf32>
    %73 = vector.multi_reduction <maximumf>, %72, %cst_26 [1] : vector<8x8xf32> to vector<8xf32>
    %74 = vector.shape_cast %73 : vector<8xf32> to vector<8x1xf32>
    %75 = vector.broadcast %74 : vector<8x1xf32> to vector<8x8xf32>
    %76 = arith.subf %72, %75 : vector<8x8xf32>
    %77 = math.exp %76 : vector<8x8xf32>
    %cst_27 = arith.constant dense<0.000000e+00> : vector<8xf32>
    %78 = vector.multi_reduction <add>, %77, %cst_27 [1] : vector<8x8xf32> to vector<8xf32>
    %79 = vector.shape_cast %78 : vector<8xf32> to vector<8x1xf32>
    %cst_28 = arith.constant dense<0.000000e+00> : vector<8x32xf32>
    %80 = tpu.matmul %77, %71, %cst_28 {dimension_numbers = #tpu.dot_dimension_numbers<[1], [0], [0], [1], [0, 0, 1, 1], [], []>} : vector<8x8xf32>, vector<8x32xf32>, vector<8x32xf32> -> vector<8x32xf32>
    %81 = tpu.reciprocal %79 : vector<8x1xf32> -> vector<8x1xf32>
    %82 = vector.broadcast %81 : vector<8x1xf32> to vector<8x32xf32>
    %83 = arith.mulf %80, %82 : vector<8x32xf32>
    %84 = arith.addf %63, %83 : vector<8x32xf32>
    %cst_29 = arith.constant 0.000000e+00 : f32
    %85 = vector.shape_cast %15 : vector<1x32xi1> to vector<1x32xi1>
    %86 = vector.broadcast %85 : vector<1x32xi1> to vector<8x32xi1>
    %87 = vector.broadcast %cst_29 : f32 to vector<8x32xf32>
    %88 = arith.select %86, %31, %87 : vector<8x32xi1>, vector<8x32xf32>
    %cst_30 = arith.constant 0.000000e+00 : f32
    %89 = vector.shape_cast %15 : vector<1x32xi1> to vector<1x32xi1>
    %90 = vector.broadcast %89 : vector<1x32xi1> to vector<8x32xi1>
    %91 = vector.broadcast %cst_30 : f32 to vector<8x32xf32>
    %92 = arith.select %90, %41, %91 : vector<8x32xi1>, vector<8x32xf32>
    %cst_31 = arith.constant dense<0.000000e+00> : vector<8x8xf32>
    %93 = tpu.matmul %88, %36, %cst_31 {dimension_numbers = #tpu.dot_dimension_numbers<[1], [1], [0], [0], [0, 0, 1, 0], [], []>} : vector<8x32xf32>, vector<8x32xf32>, vector<8x8xf32> -> vector<8x8xf32>
    %cst_32 = arith.constant dense<0xFF800000> : vector<8xf32>
    %94 = vector.multi_reduction <maximumf>, %93, %cst_32 [1] : vector<8x8xf32> to vector<8xf32>
    %95 = vector.shape_cast %94 : vector<8xf32> to vector<8x1xf32>
    %96 = vector.broadcast %95 : vector<8x1xf32> to vector<8x8xf32>
    %97 = arith.subf %93, %96 : vector<8x8xf32>
    %98 = math.exp %97 : vector<8x8xf32>
    %cst_33 = arith.constant dense<0.000000e+00> : vector<8xf32>
    %99 = vector.multi_reduction <add>, %98, %cst_33 [1] : vector<8x8xf32> to vector<8xf32>
    %100 = vector.shape_cast %99 : vector<8xf32> to vector<8x1xf32>
    %cst_34 = arith.constant dense<0.000000e+00> : vector<8x32xf32>
    %101 = tpu.matmul %98, %92, %cst_34 {dimension_numbers = #tpu.dot_dimension_numbers<[1], [0], [0], [1], [0, 0, 1, 1], [], []>} : vector<8x8xf32>, vector<8x32xf32>, vector<8x32xf32> -> vector<8x32xf32>
    %102 = tpu.reciprocal %100 : vector<8x1xf32> -> vector<8x1xf32>
    %103 = vector.broadcast %102 : vector<8x1xf32> to vector<8x32xf32>
    %104 = arith.mulf %101, %103 : vector<8x32xf32>
    %105 = arith.addf %84, %104 : vector<8x32xf32>
    %cst_35 = arith.constant 0.000000e+00 : f32
    %106 = vector.shape_cast %20 : vector<1x32xi1> to vector<1x32xi1>
    %107 = vector.broadcast %106 : vector<1x32xi1> to vector<8x32xi1>
    %108 = vector.broadcast %cst_35 : f32 to vector<8x32xf32>
    %109 = arith.select %107, %31, %108 : vector<8x32xi1>, vector<8x32xf32>
    %cst_36 = arith.constant 0.000000e+00 : f32
    %110 = vector.shape_cast %20 : vector<1x32xi1> to vector<1x32xi1>
    %111 = vector.broadcast %110 : vector<1x32xi1> to vector<8x32xi1>
    %112 = vector.broadcast %cst_36 : f32 to vector<8x32xf32>
    %113 = arith.select %111, %41, %112 : vector<8x32xi1>, vector<8x32xf32>
    %cst_37 = arith.constant dense<0.000000e+00> : vector<8x8xf32>
    %114 = tpu.matmul %109, %36, %cst_37 {dimension_numbers = #tpu.dot_dimension_numbers<[1], [1], [0], [0], [0, 0, 1, 0], [], []>} : vector<8x32xf32>, vector<8x32xf32>, vector<8x8xf32> -> vector<8x8xf32>
    %cst_38 = arith.constant dense<0xFF800000> : vector<8xf32>
    %115 = vector.multi_reduction <maximumf>, %114, %cst_38 [1] : vector<8x8xf32> to vector<8xf32>
    %116 = vector.shape_cast %115 : vector<8xf32> to vector<8x1xf32>
    %117 = vector.broadcast %116 : vector<8x1xf32> to vector<8x8xf32>
    %118 = arith.subf %114, %117 : vector<8x8xf32>
    %119 = math.exp %118 : vector<8x8xf32>
    %cst_39 = arith.constant dense<0.000000e+00> : vector<8xf32>
    %120 = vector.multi_reduction <add>, %119, %cst_39 [1] : vector<8x8xf32> to vector<8xf32>
    %121 = vector.shape_cast %120 : vector<8xf32> to vector<8x1xf32>
    %cst_40 = arith.constant dense<0.000000e+00> : vector<8x32xf32>
    %122 = tpu.matmul %119, %113, %cst_40 {dimension_numbers = #tpu.dot_dimension_numbers<[1], [0], [0], [1], [0, 0, 1, 1], [], []>} : vector<8x8xf32>, vector<8x32xf32>, vector<8x32xf32> -> vector<8x32xf32>
    %123 = tpu.reciprocal %121 : vector<8x1xf32> -> vector<8x1xf32>
    %124 = vector.broadcast %123 : vector<8x1xf32> to vector<8x32xf32>
    %125 = arith.mulf %122, %124 : vector<8x32xf32>
    %126 = arith.addf %105, %125 : vector<8x32xf32>
    %c144 = arith.constant 144 : index
    %c0_41 = arith.constant 0 : index
    %127 = vector.load %arg1[%c144, %c0_41] : memref<800x128xf32, #tpu.memory_space<vmem>>, vector<32x32xf32>
    %cst_42 = arith.constant dense<0.000000e+00> : vector<8x32xf32>
    %128 = tpu.matmul %126, %127, %cst_42 {dimension_numbers = #tpu.dot_dimension_numbers<[1], [0], [0], [1], [0, 0, 1, 1], [], []>} : vector<8x32xf32>, vector<32x32xf32>, vector<8x32xf32> -> vector<8x32xf32>
    %c176 = arith.constant 176 : index
    %c0_43 = arith.constant 0 : index
    %129 = vector.load %arg1[%c176, %c0_43] : memref<800x128xf32, #tpu.memory_space<vmem>>, vector<1x32xf32>
    %130 = vector.broadcast %129 : vector<1x32xf32> to vector<8x32xf32>
    %131 = arith.addf %128, %130 : vector<8x32xf32>
    %132 = arith.addf %26, %131 : vector<8x32xf32>
    %c360 = arith.constant 360 : index
    %c0_44 = arith.constant 0 : index
    %133 = vector.load %arg1[%c360, %c0_44] : memref<800x128xf32, #tpu.memory_space<vmem>>, vector<1x32xf32>
    %c368 = arith.constant 368 : index
    %c0_45 = arith.constant 0 : index
    %134 = vector.load %arg1[%c368, %c0_45] : memref<800x128xf32, #tpu.memory_space<vmem>>, vector<1x32xf32>
    %cst_46 = arith.constant dense<0.000000e+00> : vector<8xf32>
    %135 = vector.multi_reduction <add>, %132, %cst_46 [1] : vector<8x32xf32> to vector<8xf32>
    %136 = vector.shape_cast %135 : vector<8xf32> to vector<8x1xf32>
    %cst_47 = arith.constant 3.200000e+01 : f32
    %137 = vector.broadcast %cst_47 : f32 to vector<8x1xf32>
    %138 = arith.divf %136, %137 : vector<8x1xf32>
    %139 = arith.mulf %132, %132 : vector<8x32xf32>
    %cst_48 = arith.constant dense<0.000000e+00> : vector<8xf32>
    %140 = vector.multi_reduction <add>, %139, %cst_48 [1] : vector<8x32xf32> to vector<8xf32>
    %141 = vector.shape_cast %140 : vector<8xf32> to vector<8x1xf32>
    %cst_49 = arith.constant 3.200000e+01 : f32
    %142 = vector.broadcast %cst_49 : f32 to vector<8x1xf32>
    %143 = arith.divf %141, %142 : vector<8x1xf32>
    %144 = arith.mulf %138, %138 : vector<8x1xf32>
    %145 = arith.subf %143, %144 : vector<8x1xf32>
    %cst_50 = arith.constant 0.000000e+00 : f32
    %146 = vector.broadcast %cst_50 : f32 to vector<8x1xf32>
    %147 = arith.maximumf %145, %146 : vector<8x1xf32>
    %148 = vector.broadcast %138 : vector<8x1xf32> to vector<8x32xf32>
    %149 = arith.subf %132, %148 : vector<8x32xf32>
    %cst_51 = arith.constant 9.99999974E-6 : f32
    %150 = vector.broadcast %cst_51 : f32 to vector<8x1xf32>
    %151 = arith.addf %147, %150 : vector<8x1xf32>
    %152 = math.rsqrt %151 : vector<8x1xf32>
    %153 = vector.broadcast %152 : vector<8x1xf32> to vector<8x32xf32>
    %154 = arith.mulf %149, %153 : vector<8x32xf32>
    %155 = vector.broadcast %133 : vector<1x32xf32> to vector<8x32xf32>
    %156 = arith.mulf %154, %155 : vector<8x32xf32>
    %157 = vector.broadcast %134 : vector<1x32xf32> to vector<8x32xf32>
    %158 = arith.addf %156, %157 : vector<8x32xf32>
    %c184 = arith.constant 184 : index
    %c0_52 = arith.constant 0 : index
    %159 = vector.load %arg1[%c184, %c0_52] : memref<800x128xf32, #tpu.memory_space<vmem>>, vector<32x128xf32>
    %cst_53 = arith.constant dense<0.000000e+00> : vector<8x128xf32>
    %160 = tpu.matmul %158, %159, %cst_53 {dimension_numbers = #tpu.dot_dimension_numbers<[1], [0], [0], [1], [0, 0, 1, 1], [], []>} : vector<8x32xf32>, vector<32x128xf32>, vector<8x128xf32> -> vector<8x128xf32>
    %c216 = arith.constant 216 : index
    %c0_54 = arith.constant 0 : index
    %161 = vector.load %arg1[%c216, %c0_54] : memref<800x128xf32, #tpu.memory_space<vmem>>, vector<1x128xf32>
    %162 = vector.broadcast %161 : vector<1x128xf32> to vector<8x128xf32>
    %163 = arith.addf %160, %162 : vector<8x128xf32>
    %cst_55 = arith.constant 0.000000e+00 : f32
    %164 = vector.broadcast %cst_55 : f32 to vector<8x128xf32>
    %165 = arith.maximumf %163, %164 : vector<8x128xf32>
    %c224 = arith.constant 224 : index
    %c0_56 = arith.constant 0 : index
    %166 = vector.load %arg1[%c224, %c0_56] : memref<800x128xf32, #tpu.memory_space<vmem>>, vector<128x32xf32>
    %cst_57 = arith.constant dense<0.000000e+00> : vector<8x32xf32>
    %167 = tpu.matmul %165, %166, %cst_57 {dimension_numbers = #tpu.dot_dimension_numbers<[1], [0], [0], [1], [0, 0, 1, 1], [], []>} : vector<8x128xf32>, vector<128x32xf32>, vector<8x32xf32> -> vector<8x32xf32>
    %c352 = arith.constant 352 : index
    %c0_58 = arith.constant 0 : index
    %168 = vector.load %arg1[%c352, %c0_58] : memref<800x128xf32, #tpu.memory_space<vmem>>, vector<1x32xf32>
    %169 = vector.broadcast %168 : vector<1x32xf32> to vector<8x32xf32>
    %170 = arith.addf %167, %169 : vector<8x32xf32>
    %171 = arith.addf %158, %170 : vector<8x32xf32>
    %c376 = arith.constant 376 : index
    %c0_59 = arith.constant 0 : index
    %172 = vector.load %arg1[%c376, %c0_59] : memref<800x128xf32, #tpu.memory_space<vmem>>, vector<1x32xf32>
    %c384 = arith.constant 384 : index
    %c0_60 = arith.constant 0 : index
    %173 = vector.load %arg1[%c384, %c0_60] : memref<800x128xf32, #tpu.memory_space<vmem>>, vector<1x32xf32>
    %cst_61 = arith.constant dense<0.000000e+00> : vector<8xf32>
    %174 = vector.multi_reduction <add>, %171, %cst_61 [1] : vector<8x32xf32> to vector<8xf32>
    %175 = vector.shape_cast %174 : vector<8xf32> to vector<8x1xf32>
    %cst_62 = arith.constant 3.200000e+01 : f32
    %176 = vector.broadcast %cst_62 : f32 to vector<8x1xf32>
    %177 = arith.divf %175, %176 : vector<8x1xf32>
    %178 = arith.mulf %171, %171 : vector<8x32xf32>
    %cst_63 = arith.constant dense<0.000000e+00> : vector<8xf32>
    %179 = vector.multi_reduction <add>, %178, %cst_63 [1] : vector<8x32xf32> to vector<8xf32>
    %180 = vector.shape_cast %179 : vector<8xf32> to vector<8x1xf32>
    %cst_64 = arith.constant 3.200000e+01 : f32
    %181 = vector.broadcast %cst_64 : f32 to vector<8x1xf32>
    %182 = arith.divf %180, %181 : vector<8x1xf32>
    %183 = arith.mulf %177, %177 : vector<8x1xf32>
    %184 = arith.subf %182, %183 : vector<8x1xf32>
    %cst_65 = arith.constant 0.000000e+00 : f32
    %185 = vector.broadcast %cst_65 : f32 to vector<8x1xf32>
    %186 = arith.maximumf %184, %185 : vector<8x1xf32>
    %187 = vector.broadcast %177 : vector<8x1xf32> to vector<8x32xf32>
    %188 = arith.subf %171, %187 : vector<8x32xf32>
    %cst_66 = arith.constant 9.99999974E-6 : f32
    %189 = vector.broadcast %cst_66 : f32 to vector<8x1xf32>
    %190 = arith.addf %186, %189 : vector<8x1xf32>
    %191 = math.rsqrt %190 : vector<8x1xf32>
    %192 = vector.broadcast %191 : vector<8x1xf32> to vector<8x32xf32>
    %193 = arith.mulf %188, %192 : vector<8x32xf32>
    %194 = vector.broadcast %172 : vector<1x32xf32> to vector<8x32xf32>
    %195 = arith.mulf %193, %194 : vector<8x32xf32>
    %196 = vector.broadcast %173 : vector<1x32xf32> to vector<8x32xf32>
    %197 = arith.addf %195, %196 : vector<8x32xf32>
    %c392 = arith.constant 392 : index
    %c0_67 = arith.constant 0 : index
    %198 = vector.load %arg1[%c392, %c0_67] : memref<800x128xf32, #tpu.memory_space<vmem>>, vector<32x32xf32>
    %cst_68 = arith.constant dense<0.000000e+00> : vector<8x32xf32>
    %199 = tpu.matmul %197, %198, %cst_68 {dimension_numbers = #tpu.dot_dimension_numbers<[1], [0], [0], [1], [0, 0, 1, 1], [], []>} : vector<8x32xf32>, vector<32x32xf32>, vector<8x32xf32> -> vector<8x32xf32>
    %c424 = arith.constant 424 : index
    %c0_69 = arith.constant 0 : index
    %200 = vector.load %arg1[%c424, %c0_69] : memref<800x128xf32, #tpu.memory_space<vmem>>, vector<1x32xf32>
    %201 = vector.broadcast %200 : vector<1x32xf32> to vector<8x32xf32>
    %202 = arith.addf %199, %201 : vector<8x32xf32>
    %c432 = arith.constant 432 : index
    %c0_70 = arith.constant 0 : index
    %203 = vector.load %arg1[%c432, %c0_70] : memref<800x128xf32, #tpu.memory_space<vmem>>, vector<32x32xf32>
    %cst_71 = arith.constant dense<0.000000e+00> : vector<8x32xf32>
    %204 = tpu.matmul %197, %203, %cst_71 {dimension_numbers = #tpu.dot_dimension_numbers<[1], [0], [0], [1], [0, 0, 1, 1], [], []>} : vector<8x32xf32>, vector<32x32xf32>, vector<8x32xf32> -> vector<8x32xf32>
    %c464 = arith.constant 464 : index
    %c0_72 = arith.constant 0 : index
    %205 = vector.load %arg1[%c464, %c0_72] : memref<800x128xf32, #tpu.memory_space<vmem>>, vector<1x32xf32>
    %206 = vector.broadcast %205 : vector<1x32xf32> to vector<8x32xf32>
    %207 = arith.addf %204, %206 : vector<8x32xf32>
    %c472 = arith.constant 472 : index
    %c0_73 = arith.constant 0 : index
    %208 = vector.load %arg1[%c472, %c0_73] : memref<800x128xf32, #tpu.memory_space<vmem>>, vector<32x32xf32>
    %cst_74 = arith.constant dense<0.000000e+00> : vector<8x32xf32>
    %209 = tpu.matmul %197, %208, %cst_74 {dimension_numbers = #tpu.dot_dimension_numbers<[1], [0], [0], [1], [0, 0, 1, 1], [], []>} : vector<8x32xf32>, vector<32x32xf32>, vector<8x32xf32> -> vector<8x32xf32>
    %c504 = arith.constant 504 : index
    %c0_75 = arith.constant 0 : index
    %210 = vector.load %arg1[%c504, %c0_75] : memref<800x128xf32, #tpu.memory_space<vmem>>, vector<1x32xf32>
    %211 = vector.broadcast %210 : vector<1x32xf32> to vector<8x32xf32>
    %212 = arith.addf %209, %211 : vector<8x32xf32>
    %cst_76 = arith.constant 0.000000e+00 : f32
    %213 = vector.broadcast %cst_76 : f32 to vector<8x32xf32>
    %cst_77 = arith.constant 0.000000e+00 : f32
    %214 = vector.shape_cast %5 : vector<1x32xi1> to vector<1x32xi1>
    %215 = vector.broadcast %214 : vector<1x32xi1> to vector<8x32xi1>
    %216 = vector.broadcast %cst_77 : f32 to vector<8x32xf32>
    %217 = arith.select %215, %202, %216 : vector<8x32xi1>, vector<8x32xf32>
    %cst_78 = arith.constant 0.000000e+00 : f32
    %218 = vector.shape_cast %5 : vector<1x32xi1> to vector<1x32xi1>
    %219 = vector.broadcast %218 : vector<1x32xi1> to vector<8x32xi1>
    %220 = vector.broadcast %cst_78 : f32 to vector<8x32xf32>
    %221 = arith.select %219, %212, %220 : vector<8x32xi1>, vector<8x32xf32>
    %cst_79 = arith.constant dense<0.000000e+00> : vector<8x8xf32>
    %222 = tpu.matmul %217, %207, %cst_79 {dimension_numbers = #tpu.dot_dimension_numbers<[1], [1], [0], [0], [0, 0, 1, 0], [], []>} : vector<8x32xf32>, vector<8x32xf32>, vector<8x8xf32> -> vector<8x8xf32>
    %cst_80 = arith.constant dense<0xFF800000> : vector<8xf32>
    %223 = vector.multi_reduction <maximumf>, %222, %cst_80 [1] : vector<8x8xf32> to vector<8xf32>
    %224 = vector.shape_cast %223 : vector<8xf32> to vector<8x1xf32>
    %225 = vector.broadcast %224 : vector<8x1xf32> to vector<8x8xf32>
    %226 = arith.subf %222, %225 : vector<8x8xf32>
    %227 = math.exp %226 : vector<8x8xf32>
    %cst_81 = arith.constant dense<0.000000e+00> : vector<8xf32>
    %228 = vector.multi_reduction <add>, %227, %cst_81 [1] : vector<8x8xf32> to vector<8xf32>
    %229 = vector.shape_cast %228 : vector<8xf32> to vector<8x1xf32>
    %cst_82 = arith.constant dense<0.000000e+00> : vector<8x32xf32>
    %230 = tpu.matmul %227, %221, %cst_82 {dimension_numbers = #tpu.dot_dimension_numbers<[1], [0], [0], [1], [0, 0, 1, 1], [], []>} : vector<8x8xf32>, vector<8x32xf32>, vector<8x32xf32> -> vector<8x32xf32>
    %231 = tpu.reciprocal %229 : vector<8x1xf32> -> vector<8x1xf32>
    %232 = vector.broadcast %231 : vector<8x1xf32> to vector<8x32xf32>
    %233 = arith.mulf %230, %232 : vector<8x32xf32>
    %234 = arith.addf %213, %233 : vector<8x32xf32>
    %cst_83 = arith.constant 0.000000e+00 : f32
    %235 = vector.shape_cast %10 : vector<1x32xi1> to vector<1x32xi1>
    %236 = vector.broadcast %235 : vector<1x32xi1> to vector<8x32xi1>
    %237 = vector.broadcast %cst_83 : f32 to vector<8x32xf32>
    %238 = arith.select %236, %202, %237 : vector<8x32xi1>, vector<8x32xf32>
    %cst_84 = arith.constant 0.000000e+00 : f32
    %239 = vector.shape_cast %10 : vector<1x32xi1> to vector<1x32xi1>
    %240 = vector.broadcast %239 : vector<1x32xi1> to vector<8x32xi1>
    %241 = vector.broadcast %cst_84 : f32 to vector<8x32xf32>
    %242 = arith.select %240, %212, %241 : vector<8x32xi1>, vector<8x32xf32>
    %cst_85 = arith.constant dense<0.000000e+00> : vector<8x8xf32>
    %243 = tpu.matmul %238, %207, %cst_85 {dimension_numbers = #tpu.dot_dimension_numbers<[1], [1], [0], [0], [0, 0, 1, 0], [], []>} : vector<8x32xf32>, vector<8x32xf32>, vector<8x8xf32> -> vector<8x8xf32>
    %cst_86 = arith.constant dense<0xFF800000> : vector<8xf32>
    %244 = vector.multi_reduction <maximumf>, %243, %cst_86 [1] : vector<8x8xf32> to vector<8xf32>
    %245 = vector.shape_cast %244 : vector<8xf32> to vector<8x1xf32>
    %246 = vector.broadcast %245 : vector<8x1xf32> to vector<8x8xf32>
    %247 = arith.subf %243, %246 : vector<8x8xf32>
    %248 = math.exp %247 : vector<8x8xf32>
    %cst_87 = arith.constant dense<0.000000e+00> : vector<8xf32>
    %249 = vector.multi_reduction <add>, %248, %cst_87 [1] : vector<8x8xf32> to vector<8xf32>
    %250 = vector.shape_cast %249 : vector<8xf32> to vector<8x1xf32>
    %cst_88 = arith.constant dense<0.000000e+00> : vector<8x32xf32>
    %251 = tpu.matmul %248, %242, %cst_88 {dimension_numbers = #tpu.dot_dimension_numbers<[1], [0], [0], [1], [0, 0, 1, 1], [], []>} : vector<8x8xf32>, vector<8x32xf32>, vector<8x32xf32> -> vector<8x32xf32>
    %252 = tpu.reciprocal %250 : vector<8x1xf32> -> vector<8x1xf32>
    %253 = vector.broadcast %252 : vector<8x1xf32> to vector<8x32xf32>
    %254 = arith.mulf %251, %253 : vector<8x32xf32>
    %255 = arith.addf %234, %254 : vector<8x32xf32>
    %cst_89 = arith.constant 0.000000e+00 : f32
    %256 = vector.shape_cast %15 : vector<1x32xi1> to vector<1x32xi1>
    %257 = vector.broadcast %256 : vector<1x32xi1> to vector<8x32xi1>
    %258 = vector.broadcast %cst_89 : f32 to vector<8x32xf32>
    %259 = arith.select %257, %202, %258 : vector<8x32xi1>, vector<8x32xf32>
    %cst_90 = arith.constant 0.000000e+00 : f32
    %260 = vector.shape_cast %15 : vector<1x32xi1> to vector<1x32xi1>
    %261 = vector.broadcast %260 : vector<1x32xi1> to vector<8x32xi1>
    %262 = vector.broadcast %cst_90 : f32 to vector<8x32xf32>
    %263 = arith.select %261, %212, %262 : vector<8x32xi1>, vector<8x32xf32>
    %cst_91 = arith.constant dense<0.000000e+00> : vector<8x8xf32>
    %264 = tpu.matmul %259, %207, %cst_91 {dimension_numbers = #tpu.dot_dimension_numbers<[1], [1], [0], [0], [0, 0, 1, 0], [], []>} : vector<8x32xf32>, vector<8x32xf32>, vector<8x8xf32> -> vector<8x8xf32>
    %cst_92 = arith.constant dense<0xFF800000> : vector<8xf32>
    %265 = vector.multi_reduction <maximumf>, %264, %cst_92 [1] : vector<8x8xf32> to vector<8xf32>
    %266 = vector.shape_cast %265 : vector<8xf32> to vector<8x1xf32>
    %267 = vector.broadcast %266 : vector<8x1xf32> to vector<8x8xf32>
    %268 = arith.subf %264, %267 : vector<8x8xf32>
    %269 = math.exp %268 : vector<8x8xf32>
    %cst_93 = arith.constant dense<0.000000e+00> : vector<8xf32>
    %270 = vector.multi_reduction <add>, %269, %cst_93 [1] : vector<8x8xf32> to vector<8xf32>
    %271 = vector.shape_cast %270 : vector<8xf32> to vector<8x1xf32>
    %cst_94 = arith.constant dense<0.000000e+00> : vector<8x32xf32>
    %272 = tpu.matmul %269, %263, %cst_94 {dimension_numbers = #tpu.dot_dimension_numbers<[1], [0], [0], [1], [0, 0, 1, 1], [], []>} : vector<8x8xf32>, vector<8x32xf32>, vector<8x32xf32> -> vector<8x32xf32>
    %273 = tpu.reciprocal %271 : vector<8x1xf32> -> vector<8x1xf32>
    %274 = vector.broadcast %273 : vector<8x1xf32> to vector<8x32xf32>
    %275 = arith.mulf %272, %274 : vector<8x32xf32>
    %276 = arith.addf %255, %275 : vector<8x32xf32>
    %cst_95 = arith.constant 0.000000e+00 : f32
    %277 = vector.shape_cast %20 : vector<1x32xi1> to vector<1x32xi1>
    %278 = vector.broadcast %277 : vector<1x32xi1> to vector<8x32xi1>
    %279 = vector.broadcast %cst_95 : f32 to vector<8x32xf32>
    %280 = arith.select %278, %202, %279 : vector<8x32xi1>, vector<8x32xf32>
    %cst_96 = arith.constant 0.000000e+00 : f32
    %281 = vector.shape_cast %20 : vector<1x32xi1> to vector<1x32xi1>
    %282 = vector.broadcast %281 : vector<1x32xi1> to vector<8x32xi1>
    %283 = vector.broadcast %cst_96 : f32 to vector<8x32xf32>
    %284 = arith.select %282, %212, %283 : vector<8x32xi1>, vector<8x32xf32>
    %cst_97 = arith.constant dense<0.000000e+00> : vector<8x8xf32>
    %285 = tpu.matmul %280, %207, %cst_97 {dimension_numbers = #tpu.dot_dimension_numbers<[1], [1], [0], [0], [0, 0, 1, 0], [], []>} : vector<8x32xf32>, vector<8x32xf32>, vector<8x8xf32> -> vector<8x8xf32>
    %cst_98 = arith.constant dense<0xFF800000> : vector<8xf32>
    %286 = vector.multi_reduction <maximumf>, %285, %cst_98 [1] : vector<8x8xf32> to vector<8xf32>
    %287 = vector.shape_cast %286 : vector<8xf32> to vector<8x1xf32>
    %288 = vector.broadcast %287 : vector<8x1xf32> to vector<8x8xf32>
    %289 = arith.subf %285, %288 : vector<8x8xf32>
    %290 = math.exp %289 : vector<8x8xf32>
    %cst_99 = arith.constant dense<0.000000e+00> : vector<8xf32>
    %291 = vector.multi_reduction <add>, %290, %cst_99 [1] : vector<8x8xf32> to vector<8xf32>
    %292 = vector.shape_cast %291 : vector<8xf32> to vector<8x1xf32>
    %cst_100 = arith.constant dense<0.000000e+00> : vector<8x32xf32>
    %293 = tpu.matmul %290, %284, %cst_100 {dimension_numbers = #tpu.dot_dimension_numbers<[1], [0], [0], [1], [0, 0, 1, 1], [], []>} : vector<8x8xf32>, vector<8x32xf32>, vector<8x32xf32> -> vector<8x32xf32>
    %294 = tpu.reciprocal %292 : vector<8x1xf32> -> vector<8x1xf32>
    %295 = vector.broadcast %294 : vector<8x1xf32> to vector<8x32xf32>
    %296 = arith.mulf %293, %295 : vector<8x32xf32>
    %297 = arith.addf %276, %296 : vector<8x32xf32>
    %c512 = arith.constant 512 : index
    %c0_101 = arith.constant 0 : index
    %298 = vector.load %arg1[%c512, %c0_101] : memref<800x128xf32, #tpu.memory_space<vmem>>, vector<32x32xf32>
    %cst_102 = arith.constant dense<0.000000e+00> : vector<8x32xf32>
    %299 = tpu.matmul %297, %298, %cst_102 {dimension_numbers = #tpu.dot_dimension_numbers<[1], [0], [0], [1], [0, 0, 1, 1], [], []>} : vector<8x32xf32>, vector<32x32xf32>, vector<8x32xf32> -> vector<8x32xf32>
    %c544 = arith.constant 544 : index
    %c0_103 = arith.constant 0 : index
    %300 = vector.load %arg1[%c544, %c0_103] : memref<800x128xf32, #tpu.memory_space<vmem>>, vector<1x32xf32>
    %301 = vector.broadcast %300 : vector<1x32xf32> to vector<8x32xf32>
    %302 = arith.addf %299, %301 : vector<8x32xf32>
    %303 = arith.addf %197, %302 : vector<8x32xf32>
    %c728 = arith.constant 728 : index
    %c0_104 = arith.constant 0 : index
    %304 = vector.load %arg1[%c728, %c0_104] : memref<800x128xf32, #tpu.memory_space<vmem>>, vector<1x32xf32>
    %c736 = arith.constant 736 : index
    %c0_105 = arith.constant 0 : index
    %305 = vector.load %arg1[%c736, %c0_105] : memref<800x128xf32, #tpu.memory_space<vmem>>, vector<1x32xf32>
    %cst_106 = arith.constant dense<0.000000e+00> : vector<8xf32>
    %306 = vector.multi_reduction <add>, %303, %cst_106 [1] : vector<8x32xf32> to vector<8xf32>
    %307 = vector.shape_cast %306 : vector<8xf32> to vector<8x1xf32>
    %cst_107 = arith.constant 3.200000e+01 : f32
    %308 = vector.broadcast %cst_107 : f32 to vector<8x1xf32>
    %309 = arith.divf %307, %308 : vector<8x1xf32>
    %310 = arith.mulf %303, %303 : vector<8x32xf32>
    %cst_108 = arith.constant dense<0.000000e+00> : vector<8xf32>
    %311 = vector.multi_reduction <add>, %310, %cst_108 [1] : vector<8x32xf32> to vector<8xf32>
    %312 = vector.shape_cast %311 : vector<8xf32> to vector<8x1xf32>
    %cst_109 = arith.constant 3.200000e+01 : f32
    %313 = vector.broadcast %cst_109 : f32 to vector<8x1xf32>
    %314 = arith.divf %312, %313 : vector<8x1xf32>
    %315 = arith.mulf %309, %309 : vector<8x1xf32>
    %316 = arith.subf %314, %315 : vector<8x1xf32>
    %cst_110 = arith.constant 0.000000e+00 : f32
    %317 = vector.broadcast %cst_110 : f32 to vector<8x1xf32>
    %318 = arith.maximumf %316, %317 : vector<8x1xf32>
    %319 = vector.broadcast %309 : vector<8x1xf32> to vector<8x32xf32>
    %320 = arith.subf %303, %319 : vector<8x32xf32>
    %cst_111 = arith.constant 9.99999974E-6 : f32
    %321 = vector.broadcast %cst_111 : f32 to vector<8x1xf32>
    %322 = arith.addf %318, %321 : vector<8x1xf32>
    %323 = math.rsqrt %322 : vector<8x1xf32>
    %324 = vector.broadcast %323 : vector<8x1xf32> to vector<8x32xf32>
    %325 = arith.mulf %320, %324 : vector<8x32xf32>
    %326 = vector.broadcast %304 : vector<1x32xf32> to vector<8x32xf32>
    %327 = arith.mulf %325, %326 : vector<8x32xf32>
    %328 = vector.broadcast %305 : vector<1x32xf32> to vector<8x32xf32>
    %329 = arith.addf %327, %328 : vector<8x32xf32>
    %c552 = arith.constant 552 : index
    %c0_112 = arith.constant 0 : index
    %330 = vector.load %arg1[%c552, %c0_112] : memref<800x128xf32, #tpu.memory_space<vmem>>, vector<32x128xf32>
    %cst_113 = arith.constant dense<0.000000e+00> : vector<8x128xf32>
    %331 = tpu.matmul %329, %330, %cst_113 {dimension_numbers = #tpu.dot_dimension_numbers<[1], [0], [0], [1], [0, 0, 1, 1], [], []>} : vector<8x32xf32>, vector<32x128xf32>, vector<8x128xf32> -> vector<8x128xf32>
    %c584 = arith.constant 584 : index
    %c0_114 = arith.constant 0 : index
    %332 = vector.load %arg1[%c584, %c0_114] : memref<800x128xf32, #tpu.memory_space<vmem>>, vector<1x128xf32>
    %333 = vector.broadcast %332 : vector<1x128xf32> to vector<8x128xf32>
    %334 = arith.addf %331, %333 : vector<8x128xf32>
    %cst_115 = arith.constant 0.000000e+00 : f32
    %335 = vector.broadcast %cst_115 : f32 to vector<8x128xf32>
    %336 = arith.maximumf %334, %335 : vector<8x128xf32>
    %c592 = arith.constant 592 : index
    %c0_116 = arith.constant 0 : index
    %337 = vector.load %arg1[%c592, %c0_116] : memref<800x128xf32, #tpu.memory_space<vmem>>, vector<128x32xf32>
    %cst_117 = arith.constant dense<0.000000e+00> : vector<8x32xf32>
    %338 = tpu.matmul %336, %337, %cst_117 {dimension_numbers = #tpu.dot_dimension_numbers<[1], [0], [0], [1], [0, 0, 1, 1], [], []>} : vector<8x128xf32>, vector<128x32xf32>, vector<8x32xf32> -> vector<8x32xf32>
    %c720 = arith.constant 720 : index
    %c0_118 = arith.constant 0 : index
    %339 = vector.load %arg1[%c720, %c0_118] : memref<800x128xf32, #tpu.memory_space<vmem>>, vector<1x32xf32>
    %340 = vector.broadcast %339 : vector<1x32xf32> to vector<8x32xf32>
    %341 = arith.addf %338, %340 : vector<8x32xf32>
    %342 = arith.addf %329, %341 : vector<8x32xf32>
    %c744 = arith.constant 744 : index
    %c0_119 = arith.constant 0 : index
    %343 = vector.load %arg1[%c744, %c0_119] : memref<800x128xf32, #tpu.memory_space<vmem>>, vector<1x32xf32>
    %c752 = arith.constant 752 : index
    %c0_120 = arith.constant 0 : index
    %344 = vector.load %arg1[%c752, %c0_120] : memref<800x128xf32, #tpu.memory_space<vmem>>, vector<1x32xf32>
    %cst_121 = arith.constant dense<0.000000e+00> : vector<8xf32>
    %345 = vector.multi_reduction <add>, %342, %cst_121 [1] : vector<8x32xf32> to vector<8xf32>
    %346 = vector.shape_cast %345 : vector<8xf32> to vector<8x1xf32>
    %cst_122 = arith.constant 3.200000e+01 : f32
    %347 = vector.broadcast %cst_122 : f32 to vector<8x1xf32>
    %348 = arith.divf %346, %347 : vector<8x1xf32>
    %349 = arith.mulf %342, %342 : vector<8x32xf32>
    %cst_123 = arith.constant dense<0.000000e+00> : vector<8xf32>
    %350 = vector.multi_reduction <add>, %349, %cst_123 [1] : vector<8x32xf32> to vector<8xf32>
    %351 = vector.shape_cast %350 : vector<8xf32> to vector<8x1xf32>
    %cst_124 = arith.constant 3.200000e+01 : f32
    %352 = vector.broadcast %cst_124 : f32 to vector<8x1xf32>
    %353 = arith.divf %351, %352 : vector<8x1xf32>
    %354 = arith.mulf %348, %348 : vector<8x1xf32>
    %355 = arith.subf %353, %354 : vector<8x1xf32>
    %cst_125 = arith.constant 0.000000e+00 : f32
    %356 = vector.broadcast %cst_125 : f32 to vector<8x1xf32>
    %357 = arith.maximumf %355, %356 : vector<8x1xf32>
    %358 = vector.broadcast %348 : vector<8x1xf32> to vector<8x32xf32>
    %359 = arith.subf %342, %358 : vector<8x32xf32>
    %cst_126 = arith.constant 9.99999974E-6 : f32
    %360 = vector.broadcast %cst_126 : f32 to vector<8x1xf32>
    %361 = arith.addf %357, %360 : vector<8x1xf32>
    %362 = math.rsqrt %361 : vector<8x1xf32>
    %363 = vector.broadcast %362 : vector<8x1xf32> to vector<8x32xf32>
    %364 = arith.mulf %359, %363 : vector<8x32xf32>
    %365 = vector.broadcast %343 : vector<1x32xf32> to vector<8x32xf32>
    %366 = arith.mulf %364, %365 : vector<8x32xf32>
    %367 = vector.broadcast %344 : vector<1x32xf32> to vector<8x32xf32>
    %368 = arith.addf %366, %367 : vector<8x32xf32>
    %c760 = arith.constant 760 : index
    %c0_127 = arith.constant 0 : index
    %369 = vector.load %arg1[%c760, %c0_127] : memref<800x128xf32, #tpu.memory_space<vmem>>, vector<32x8xf32>
    %cst_128 = arith.constant dense<0.000000e+00> : vector<8x8xf32>
    %370 = tpu.matmul %368, %369, %cst_128 {dimension_numbers = #tpu.dot_dimension_numbers<[1], [0], [0], [1], [0, 0, 1, 1], [], []>} : vector<8x32xf32>, vector<32x8xf32>, vector<8x8xf32> -> vector<8x8xf32>
    %c792 = arith.constant 792 : index
    %c0_129 = arith.constant 0 : index
    %371 = vector.load %arg1[%c792, %c0_129] : memref<800x128xf32, #tpu.memory_space<vmem>>, vector<1x8xf32>
    %372 = vector.broadcast %371 : vector<1x8xf32> to vector<8x8xf32>
    %373 = arith.addf %370, %372 : vector<8x8xf32>
    %c0_130 = arith.constant 0 : index
    %c0_131 = arith.constant 0 : index
    %374 = vector.load %arg2[%c0_130, %c0_131] : memref<8x8xf32, #tpu.memory_space<vmem>>, vector<8x8xf32>
    tpu.vector_store %arg2[%c0_130, %c0_131], %373 {strides = array<i32>} : memref<8x8xf32, #tpu.memory_space<vmem>>, vector<8x8xf32>,
    return
  }
}

</mosaic_0001>

<bundles_post_ra>
// kernel: tpu_custom_call.1
= control target key start
LH: loop header
LB: loop body
LE: loop exit
PB: predicated region body
PF: predicated region fallthrough
CT: control target
= control target key end

     0   :  { %7 = vsyncpa [#allocation3], 0  ;;  %s3673_s0 = inlined_call_operand.hbm [shape: f32[8,16], index: 0, kind: input, shape index: {}]   ;;  %s3674_s1 = inlined_call_operand.hbm [shape: f32[800,128], index: 1, kind: input, shape index: {}]   ;;  %s3675_s2 = inlined_call_operand.hbm [shape: f32[8,8], index: 2, kind: output, shape index: {}]  }
   0x1   :  { %8 = vsyncpa [#allocation6], 0 }
   0x2   :  { %9 = vsyncpa [#allocation4], 0  ;;  %s3343_s9 = smov [#allocation2]   ;;  %s3344_s11 = smov [#allocation5]  }
   0x3   :  { %s16_s10 = sshll.u32 %s3343_s9, 4  ;;  %s25_s12 = sshll.u32 %s3344_s11, 4  ;;  %s17_s10 = int_to_ptr.vmem [resolvable:$true] %s16_s10  ;;  %s3366_s12 = int_to_ptr.vmem [resolvable:$true] %s25_s12 }
   0x4   :  { %s3271_s15 = scalar_lea.hbm %s3673_s0, 128 }
   0x5   :  { %p3272_p0 = scmp.ne.s32.totalorder %s3673_s0, %s3271_s15  ;;  %p3275_p1 = scmp.lt.u32.totalorder %s3271_s15, %s3673_s0 }
   0x7   :  { %p3277_p2 = pnand %p3275_p1, %p3272_p0 }
   0x9   :  { %3280 = shalt.err (!%p3277_p2)
}
   0xa   :  { %s3281_s20 = scalar_lea.vmem %s17_s10, 128  ;;  %p3286_p4 = scmp.lt.s32.totalorder %s17_s10, %s17_s10 }
   0xb   :  { %p3282_p3 = scmp.ne.s32.totalorder %s17_s10, %s3281_s20  ;;  %p3287_p5 = scmp.lt.s32.totalorder %s3281_s20, %s3281_s20 }
   0xd   :  { %p3288_p6 = por %p3287_p5, %p3286_p4 }
   0xf   :  { %p3289_p7 = pnand %p3288_p6, %p3282_p3 }
  0x11   :  { %3292 = shalt.err (!%p3289_p7)
}
  0x12   :  { %19 = dma.hbm_to_vmem [thread:$0]  %s3673_s0, 128, %s17_s10, [#allocation3]  }
  0x13   :  { %s3293_s25 = scalar_lea.hbm %s3674_s1, 12800 }
  0x14   :  { %p3294_p8 = scmp.ne.s32.totalorder %s3674_s1, %s3293_s25  ;;  %p3297_p9 = scmp.lt.u32.totalorder %s3293_s25, %s3674_s1 }
  0x16   :  { %p3299_p10 = pnand %p3297_p9, %p3294_p8 }
  0x18   :  { %3302 = shalt.err (!%p3299_p10)
}
  0x19   :  { %s3303_s30 = scalar_lea.vmem %s3366_s12, 12800  ;;  %p3308_p12 = scmp.lt.s32.totalorder %s3366_s12, %s3366_s12 }
  0x1a   :  { %p3304_p11 = scmp.ne.s32.totalorder %s3366_s12, %s3303_s30  ;;  %p3309_p13 = scmp.lt.s32.totalorder %s3303_s30, %s3303_s30 }
  0x1c   :  { %p3310_p0 = por %p3309_p13, %p3308_p12 }
  0x1e   :  { %p3311_p1 = pnand %p3310_p0, %p3304_p11 }
  0x20   :  { %3314 = shalt.err (!%p3311_p1)
}
  0x21   :  { %s3345_s0 = smov 128   ;;  %s3346_s3 = smov 8  }
  0x22   :  { %31 = dma.hbm_to_vmem [thread:$0]  %s3674_s1, 12800, %s3366_s12, [#allocation6], %s3345_s0, %s3345_s0, %s3346_s3  }
  0x23   :  { %3337 = dma.done.wait [#allocation3], 128  }
  0x24   :  { %3338 = vsyncadd [#allocation3], 4294967168 }
  0x25   :  { %3339 = dma.done.wait [#allocation6], 12800  }
  0x26   :  { %3340 = vsyncadd [#allocation6], 4294954496  ;;  %v3347_v0 = vmov 0.0|0.0   ;;  %vm3348_vm0 = vmmov 0   ;;  %v3349_v1 = vmov 0.0   ;;  %v53_v2 = vld [vmem:[#allocation5] sm:$0xff]  ;;  %v38_v28 = vlaneseq }
  0x27   :  { %3106 = vmatprep.subr.bf16.mxu0 %v3347_v0  ;;  %2832 = vmatprep.mubr.msk.f32.mxu0 %vm3348_vm0, %v3349_v1  ;;  %v54_v3 = vld [vmem:[#allocation5 + $0x8] sm:$0xff]  ;;  %v134_v5 = vld [vmem:[#allocation5 + $0x18] sm:$0xff]  ;;  %v135_v6 = vld [vmem:[#allocation5 + $0x20] sm:$0xff]  ;;  %vm60_vm1 = vcmask 130048   ;;  %vm143_vm2 = vcmask 261120   ;;  %vm455_vm13 = vcmask 64512  }
  0x28   :  { %3121 = vmatprep.subr.bf16.mxu1 %v3347_v0  ;;  %2865 = vmatprep.mubr.msk.f32.mxu1 %vm3348_vm0, %v3349_v1  ;;  %v3107_v4 = vpack.c.bf16 %v54_v3, %v53_v2  ;;  %v296_v7 = vld [vmem:[#allocation5 + $0x68] sm:$0xff]  ;;  %v297_v8 = vld [vmem:[#allocation5 + $0x70] sm:$0xff]  ;;  %v52_v9 = vld [vmem:[#allocation2] sm:$0xff]  ;;  %v3110_v10 = vpack.c.bf16 %v135_v6, %v134_v5  ;;  %v3426_v33 = vand.u32 127, %v38_v28  ;;  %s3350_s1 = smov [#allocation7]  }
  0x29   :  { %v3122_v11 = vpack.c.bf16 %v297_v8, %v296_v7  ;;  %v136_v12 = vld [vmem:[#allocation5 + $0x28] sm:$0xff]  ;;  %v137_v13 = vld [vmem:[#allocation5 + $0x30] sm:$0xff]  ;;  %v298_v15 = vld [vmem:[#allocation5 + $0x78] sm:$0xff]  ;;  %s2628_s6 = sshll.u32 %s3350_s1, 4  ;;  %s2629_s6 = int_to_ptr.vmem [resolvable:$true] %s2628_s6 }
  0x2a   :  { %3108 = vmatpush3.bf16.msra.mxu0 %v3107_v4  ;;  %v3113_v14 = vpack.c.bf16 %v137_v13, %v136_v12  ;;  %v299_v16 = vld [vmem:[#allocation5 + $0x80] sm:$0xff]  ;;  %v218_v19 = vld [vmem:[#allocation5 + $0x48] sm:$0xff]  ;;  %v2638_v20 = vld [vmem:[#allocation5 + $0x10] ss:$0 sm:$0xff]  ;;  %vm43_vm3 = vcmp.ge.s32.totalorder %v3426_v33, 8  ;;  %vm44_vm4 = vcmp.lt.s32.totalorder %v3426_v33, 16  ;;  %p3320_p3 = scmp.lt.s32.totalorder %s2629_s6, %s2629_s6 }
  0x2b   :  { %3109 = vmatprep.subr.bf16.mxu0 %v3347_v0  ;;  %3123 = vmatpush3.bf16.msra.mxu1 %v3122_v11  ;;  %v3125_v17 = vpack.c.bf16 %v299_v16, %v298_v15  ;;  %v217_v18 = vld [vmem:[#allocation5 + $0x40] sm:$0xff]  ;;  %v219_v25 = vld [vmem:[#allocation5 + $0x50] sm:$0xff]  ;;  %v220_v26 = vld [vmem:[#allocation5 + $0x58] sm:$0xff]  ;;  %vm41_vm5 = vcmp.lt.s32.totalorder %v3426_v33, 8  ;;  %vm46_vm7 = vcmp.ge.s32.totalorder %v3426_v33, 16  ;;  %vm47_vm8 = vcmp.lt.s32.totalorder %v3426_v33, 24 }
  0x2c   :  { %3124 = vmatprep.subr.bf16.mxu1 %v3347_v0  ;;  %v3116_v22 = vpack.c.bf16 %v218_v19, %v217_v18  ;;  %v3119_v27 = vpack.c.bf16 %v220_v26, %v219_v25  ;;  %v2640_v34 = vld [vmem:[#allocation5 + $0x38] ss:$0 sm:$0xff]  ;;  %v2642_v35 = vld [vmem:[#allocation5 + $0x60] ss:$0 sm:$0xff]  ;;  %v2644_v40 = vld [vmem:[#allocation5 + $0x88] ss:$0 sm:$0xff] }
  0x2d   :  { %2833 = vmatmul.mubr.msk.f32.vlgmr.msra.gmra.mrb[0].mxu0 %vm60_vm1, %v52_v9  ;;  %vm3431_vm6 = vmand %vm43_vm3, %vm44_vm4  ;;  %vm49_vm10 = vcmp.ge.s32.totalorder %v3426_v33, 24  ;;  %vm50_vm11 = vcmp.lt.s32.totalorder %v3426_v33, 32  ;;  %v1027_v19 = vld [vmem:[#allocation5 + $0x90] sm:$0xff]  ;;  %v2225_v45 = vld [vmem:[#allocation5 + $0x200] sm:$0xff]  ;;  %s3315_s7 = scalar_lea.vmem %s2629_s6, 128 }
  0x2e   :  { %3111 = vmatpush3.bf16.msra.mxu0 %v3110_v10  ;;  %2843 = vmatprep.mubr.msk.f32.mxu0 %vm3348_vm0, %v3349_v1  ;;  %vm3449_vm9 = vmand %vm46_vm7, %vm47_vm8  ;;  %p3316_p2 = scmp.ne.s32.totalorder %s2629_s6, %s3315_s7  ;;  %p3321_p4 = scmp.lt.s32.totalorder %s3315_s7, %s3315_s7 }
  0x2f   :  { %3112 = vmatprep.subr.bf16.mxu0 %v3347_v0  ;;  %3126 = vmatpush3.bf16.msra.mxu1 %v3125_v17  ;;  %vm3468_vm12 = vmand %vm49_vm10, %vm50_vm11 }
  0x30   :  { %2878 = vmatprep.subr.mxu1 %v3349_v1  ;;  %p3322_p5 = por %p3321_p4, %p3320_p3 }
  0x32   :  { %3114 = vmatpush3.bf16.msra.mxu0 %v3113_v14  ;;  %p3323_p6 = pnand %p3322_p5, %p3316_p2 }
  0x33   :  { %3115 = vmatprep.subr.bf16.mxu0 %v3347_v0 }
 0x100   :  { %v130_v21 = vpop.f32.mrb[0].mxu0 }
 0x101   :  { %v3410_v23 = vadd.f32 %v2638_v20, %v130_v21  ;;  %v2834_v24 = vpop.f32.mrb[1].mxu0  ;;  %v1028_v20 = vld [vmem:[#allocation5 + $0x98] sm:$0xff] }
 0x102   :  { %v3128_v21 = vpack.c.bf16 %v1028_v20, %v1027_v19  ;;  %v1030_v24 = vld [vmem:[#allocation5 + $0xa8] sm:$0xff]  ;;  %v1232_v19 = vld [vmem:[#allocation5 + $0x130] sm:$0xff]  ;;  %v1233_v20 = vld [vmem:[#allocation5 + $0x138] sm:$0xff] }
 0x103   :  { %2844 = vmatmul.mubr.msk.f32.vlgmr.msra.gmra.mrb[2].mxu0 %vm143_vm2, %v3410_v23  ;;  %2866 = vmatmul.mubr.msk.f32.vlgmr.msra.gmra.mrb[0].mxu1 %vm143_vm2, %v3410_v23 }
 0x104   :  { %3117 = vmatpush3.bf16.msra.mxu0 %v3116_v22  ;;  %2854 = vmatprep.mubr.msk.f32.mxu0 %vm3348_vm0, %v3349_v1  ;;  %v1029_v22 = vld [vmem:[#allocation5 + $0xa0] sm:$0xff] }
 0x105   :  { %3118 = vmatprep.subr.bf16.mxu0 %v3347_v0  ;;  %2880 = vmatprep.mubr.msk.f32.mxu1 %vm3348_vm0, %v3349_v1  ;;  %v3131_v25 = vpack.c.bf16 %v1030_v24, %v1029_v22  ;;  %v1234_v22 = vld [vmem:[#allocation5 + $0x140] sm:$0xff]  ;;  %v1235_v24 = vld [vmem:[#allocation5 + $0x148] sm:$0xff] }
 0x108   :  { %3120 = vmatpush3.bf16.msra.mxu0 %v3119_v27 }
 0x109   :  { %2868 = vmatprep.subr.mxu0 %v3349_v1 }
 0x10b   :  { %2855 = vmatmul.mubr.msk.f32.vlgmr.msra.gmra.mrb[4].mxu0 %vm143_vm2, %v3410_v23 }
 0x10c   :  { %2870 = vmatprep.mubr.msk.f32.mxu0 %vm3348_vm0, %v3349_v1 }
 0x1d6   :  { %v213_v29 = vpop.f32.mrb[2].mxu0  ;;  %v371_v30 = vpop.f32.mrb[0].mxu1 }
 0x1d7   :  { %v2845_v31 = vpop.f32.mrb[3].mxu0  ;;  %v2867_v32 = vpop.f32.mrb[1].mxu1  ;;  %v214_v37 = vadd.f32 %v2640_v34, %v213_v29  ;;  %v3441_v42 = vadd.f32 %v2644_v40, %v371_v30 }
 0x1d9   :  { %v377_v43 = vsel %vm41_vm5, %v214_v37, 0.0  ;;  %v543_v44 = vsel %vm3431_vm6, %v214_v37, 0.0  ;;  %v705_v46 = vsel %vm3449_vm9, %v214_v37, 0.0  ;;  %v867_v48 = vsel %vm3468_vm12, %v214_v37, 0.0 }
 0x1de   :  { %v292_v36 = vpop.f32.mrb[4].mxu0 }
 0x1df   :  { %v293_v38 = vadd.f32 %v2642_v35, %v292_v36  ;;  %v2856_v39 = vpop.f32.mrb[5].mxu0 }
 0x1e1   :  { %2869 = vmatpush3.xpose.msk.msra.mxu0 %vm143_vm2, %v293_v38  ;;  %2879 = vmatpush3.xpose.msk.msra.mxu1 %vm143_vm2, %v293_v38 }
 0x1e2   :  { %2873 = vmatprep.subr.mxu0 %v3349_v1  ;;  %2888 = vmatprep.subr.mxu1 %v3349_v1 }
 0x1e4   :  { %2871 = vmatmul.mubr.msk.f32.vlgmr.msra.gmra.mrb[6].mxu0 %vm143_vm2, %v377_v43  ;;  %2881 = vmatmul.mubr.msk.f32.vlgmr.msra.gmra.mrb[2].mxu1 %vm143_vm2, %v543_v44 }
 0x1e5   :  { %2874 = vmatpush3.msk.msra.mxu0 %vm41_vm5, %v3441_v42  ;;  %2889 = vmatpush3.xpose.msk.msra.mxu1 %vm143_vm2, %v293_v38 }
 0x1e6   :  { %2890 = vmatprep.mubr.msk.f32.mxu1 %vm3348_vm0, %v3349_v1  ;;  %2898 = vmatprep.subr.mxu1 %v3349_v1 }
 0x1e7   :  { %2875 = vmatprep.mubr.msk.f32.mxu0 %vm3348_vm0, %v3349_v1  ;;  %2883 = vmatprep.subr.mxu0 %v3349_v1 }
 0x1e8   :  { %2891 = vmatmul.mubr.msk.f32.vlgmr.msra.gmra.mrb[4].mxu1 %vm143_vm2, %v705_v46 }
 0x1e9   :  { %2899 = vmatpush3.xpose.msk.msra.mxu1 %vm143_vm2, %v293_v38  ;;  %2900 = vmatprep.mubr.msk.f32.mxu1 %vm3348_vm0, %v3349_v1 }
 0x1ea   :  { %3127 = vmatprep.subr.bf16.mxu1 %v3347_v0 }
 0x1ec   :  { %2901 = vmatmul.mubr.msk.f32.vlgmr.msra.gmra.mrb[6].mxu1 %vm143_vm2, %v867_v48 }
 0x1ed   :  { %2916 = vmatprep.mubr.msk.f32.mxu1 %vm3348_vm0, %v3349_v1  ;;  %3129 = vmatpush3.bf16.msra.mxu1 %v3128_v21  ;;  %v3155_v21 = vpack.c.bf16 %v1233_v20, %v1232_v19 }
 0x1ee   :  { %3130 = vmatprep.subr.bf16.mxu1 %v3347_v0 }
 0x1f1   :  { %3132 = vmatpush3.bf16.msra.mxu1 %v3131_v25  ;;  %v3158_v25 = vpack.c.bf16 %v1235_v24, %v1234_v22  ;;  %v1426_v22 = vld [vmem:[#allocation5 + $0x1c0] sm:$0xff]  ;;  %v1427_v24 = vld [vmem:[#allocation5 + $0x1c8] sm:$0xff] }
 0x1f2   :  { %3139 = vmatprep.subr.bf16.mxu1 %v3347_v0 }
 0x2b7   :  { %v451_v49 = vpop.f32.mrb[6].mxu0  ;;  %v614_v50 = vpop.f32.mrb[2].mxu1 }
 0x2b8   :  { %v2872_v51 = vpop.f32.mrb[7].mxu0  ;;  %v2882_v52 = vpop.f32.mrb[3].mxu1  ;;  %v456_v53 = vsel %vm455_vm13, %v451_v49, -inf  ;;  %v618_v57 = vsel %vm455_vm13, %v614_v50, -inf }
 0x2b9   :  { %457 = vmax.xlane.f32.xlu0 %v456_v53  ;;  %v2662_v53 = vld [vmem:[#allocation5 + $0xb0] ss:$0 sm:$0xff] }
 0x2bb   :  { %v776_v54 = vpop.f32.mrb[4].mxu1 }
 0x2bc   :  { %v2892_v55 = vpop.f32.mrb[5].mxu1  ;;  %v780_v56 = vsel %vm455_vm13, %v776_v54, -inf }
 0x2bd   :  { %781 = vmax.xlane.f32.xlu1 %v780_v56  ;;  %619 = vmax.xlane.f32.xlu0 %v618_v57 }
 0x2bf   :  { %v938_v58 = vpop.f32.mrb[6].mxu1 }
 0x2c0   :  { %v2902_v59 = vpop.f32.mrb[7].mxu1  ;;  %v942_v60 = vsel %vm455_vm13, %v938_v58, -inf }
 0x2c1   :  { %943 = vmax.xlane.f32.xlu1 %v942_v60 }
 0x346   :  { %v458_v61 = vpop.xlane.xlu0 %457 }
 0x347   :  { %v459_v62 = vsub.f32 %v451_v49, %v458_v61  ;;  %v1139_v61 = vld [vmem:[#allocation5 + $0xb8] sm:$0xff] }
 0x349   :  { %v460_v63 = vmul.f32 1.442695, %v459_v62  ;;  %v1140_v62 = vld [vmem:[#allocation5 + $0xc0] sm:$0xff] }
 0x34a   :  { %v782_v2 = vpop.xlane.xlu1 %781  ;;  %v620_v3 = vpop.xlane.xlu0 %619 }
 0x34b   :  { %3231 = vpow2.f32 %v460_v63  ;;  %v783_v4 = vsub.f32 %v776_v54, %v782_v2  ;;  %v621_v5 = vsub.f32 %v614_v50, %v620_v3  ;;  %v3134_v63 = vpack.c.bf16 %v1140_v62, %v1139_v61  ;;  %v1141_v2 = vld [vmem:[#allocation5 + $0xc8] sm:$0xff]  ;;  %v1142_v3 = vld [vmem:[#allocation5 + $0xd0] sm:$0xff] }
 0x34c   :  { %v1342_v61 = vld [vmem:[#allocation5 + $0x188] sm:$0xff]  ;;  %v1343_v62 = vld [vmem:[#allocation5 + $0x190] sm:$0xff] }
 0x34d   :  { %v784_v6 = vmul.f32 1.442695, %v783_v4  ;;  %v622_v7 = vmul.f32 1.442695, %v621_v5  ;;  %v1222_v4 = vld [vmem:[#allocation5 + $0xe0] sm:$0xff]  ;;  %v1223_v5 = vld [vmem:[#allocation5 + $0xe8] sm:$0xff] }
 0x34e   :  { %v944_v8 = vpop.xlane.xlu1 %943 }
 0x34f   :  { %3233 = vpow2.f32 %v784_v6  ;;  %v945_v9 = vsub.f32 %v938_v58, %v944_v8  ;;  %v1224_v6 = vld [vmem:[#allocation5 + $0xf0] sm:$0xff]  ;;  %v1225_v8 = vld [vmem:[#allocation5 + $0xf8] sm:$0xff] }
 0x350   :  { %3235 = vpow2.f32 %v622_v7  ;;  %v3140_v7 = vpack.c.bf16 %v1223_v5, %v1222_v4 }
 0x351   :  { %v946_v10 = vmul.f32 1.442695, %v945_v9  ;;  %v3143_v9 = vpack.c.bf16 %v1225_v8, %v1224_v6 }
 0x353   :  { %3237 = vpow2.f32 %v946_v10  ;;  %v1226_v10 = vld [vmem:[#allocation5 + $0x100] sm:$0xff] }
 0x355   :  { %v3232_v11 = vpop.eup %3231 }
 0x356   :  { %2876 = vmatmul.mubr.msk.f32.vlgmr.msra.gmra.mrb[8].mxu0 %vm455_vm13, %v3232_v11  ;;  %v462_v12 = vsel %vm455_vm13, %v3232_v11, 0.0  ;;  %v1227_v11 = vld [vmem:[#allocation5 + $0x108] sm:$0xff] }
 0x357   :  { %2884 = vmatpush3.msk.msra.mxu0 %vm3431_vm6, %v3441_v42  ;;  %463 = vadd.xlane.f32.xlu0 %v462_v12  ;;  %v3146_v12 = vpack.c.bf16 %v1227_v11, %v1226_v10 }
 0x358   :  { %2885 = vmatprep.mubr.msk.f32.mxu0 %vm3348_vm0, %v3349_v1  ;;  %2893 = vmatprep.subr.mxu0 %v3349_v1 }
 0x359   :  { %v3234_v13 = vpop.eup %3233 }
 0x35a   :  { %v3236_v14 = vpop.eup %3235  ;;  %v786_v15 = vsel %vm455_vm13, %v3234_v13, 0.0 }
 0x35b   :  { %2886 = vmatmul.mubr.msk.f32.vlgmr.msra.gmra.mrb[10].mxu0 %vm455_vm13, %v3236_v14  ;;  %787 = vadd.xlane.f32.xlu0 %v786_v15  ;;  %v624_v16 = vsel %vm455_vm13, %v3236_v14, 0.0  ;;  %v1229_v14 = vld [vmem:[#allocation5 + $0x118] sm:$0xff] }
 0x35c   :  { %2894 = vmatpush3.msk.msra.mxu0 %vm3449_vm9, %v3441_v42  ;;  %625 = vadd.xlane.f32.xlu1 %v624_v16  ;;  %v1230_v16 = vld [vmem:[#allocation5 + $0x120] sm:$0xff] }
 0x35d   :  { %v3238_v17 = vpop.eup %3237  ;;  %2895 = vmatprep.mubr.msk.f32.mxu0 %vm3348_vm0, %v3349_v1  ;;  %2903 = vmatprep.subr.mxu0 %v3349_v1 }
 0x35e   :  { %v948_v18 = vsel %vm455_vm13, %v3238_v17, 0.0 }
 0x35f   :  { %2896 = vmatmul.mubr.msk.f32.vlgmr.msra.gmra.mrb[12].mxu0 %vm455_vm13, %v3234_v13  ;;  %v1228_v13 = vld [vmem:[#allocation5 + $0x110] sm:$0xff] }
 0x360   :  { %2904 = vmatpush3.msk.msra.mxu0 %vm3468_vm12, %v3441_v42  ;;  %949 = vadd.xlane.f32.xlu1 %v948_v18  ;;  %v3149_v15 = vpack.c.bf16 %v1229_v14, %v1228_v13  ;;  %v2669_v14 = vld [vmem:[#allocation5 + $0x178] ss:$0 sm:$0xff] }
 0x361   :  { %2905 = vmatprep.mubr.msk.f32.mxu0 %vm3348_vm0, %v3349_v1  ;;  %3133 = vmatprep.subr.bf16.mxu0 %v3347_v0 }
 0x363   :  { %2906 = vmatmul.mubr.msk.f32.vlgmr.msra.gmra.mrb[14].mxu0 %vm455_vm13, %v3238_v17  ;;  %v1231_v17 = vld [vmem:[#allocation5 + $0x128] sm:$0xff] }
 0x364   :  { %2927 = vmatprep.mubr.msk.f32.mxu0 %vm3348_vm0, %v3349_v1  ;;  %3135 = vmatpush3.bf16.msra.mxu0 %v3134_v63  ;;  %v3152_v18 = vpack.c.bf16 %v1231_v17, %v1230_v16  ;;  %v3164_v63 = vpack.c.bf16 %v1343_v62, %v1342_v61  ;;  %v1424_v16 = vld [vmem:[#allocation5 + $0x1b0] sm:$0xff]  ;;  %v1425_v17 = vld [vmem:[#allocation5 + $0x1b8] sm:$0xff] }
 0x365   :  { %3136 = vmatprep.subr.bf16.mxu0 %v3347_v0  ;;  %v3170_v20 = vpack.c.bf16 %v1425_v17, %v1424_v16 }
 0x3e4   :  { %v464_v26 = vpop.xlane.xlu0 %463 }
 0x3e5   :  { %3239 = vrcp.f32 %v464_v26 }
 0x3e8   :  { %v788_v28 = vpop.xlane.xlu0 %787 }
 0x3e9   :  { %v626_v27 = vpop.xlane.xlu1 %625 }
 0x3ea   :  { %3241 = vrcp.f32 %v626_v27 }
 0x3eb   :  { %3243 = vrcp.f32 %v788_v28 }
 0x3ed   :  { %v950_v29 = vpop.xlane.xlu1 %949 }
 0x3ee   :  { %3245 = vrcp.f32 %v950_v29 }
 0x3ef   :  { %v3240_v32 = vpop.eup %3239 }
 0x3f4   :  { %v3242_v34 = vpop.eup %3241 }
 0x3f5   :  { %v3244_v40 = vpop.eup %3243 }
 0x3f8   :  { %v3246_v48 = vpop.eup %3245 }
 0x429   :  { %v534_v30 = vpop.f32.mrb[8].mxu0 }
 0x42a   :  { %v2877_v31 = vpop.f32.mrb[9].mxu0  ;;  %v539_v36 = vmul.f32 %v3240_v32, %v534_v30 }
 0x42e   :  { %v696_v35 = vpop.f32.mrb[10].mxu0 }
 0x42f   :  { %v701_v37 = vmul.f32 %v3242_v34, %v696_v35  ;;  %v2887_v38 = vpop.f32.mrb[11].mxu0 }
 0x431   :  { %v702_v39 = vadd.f32 %v701_v37, %v539_v36  ;;  %v2664_v37 = vld [vmem:[#allocation5 + $0x168] ss:$0 sm:$0xff] }
 0x432   :  { %v858_v42 = vpop.f32.mrb[12].mxu0 }
 0x433   :  { %v863_v43 = vmul.f32 %v3244_v40, %v858_v42  ;;  %v2897_v44 = vpop.f32.mrb[13].mxu0 }
 0x434   :  { %v1237_v44 = vld [vmem:[#allocation5 + $0x158] sm:$0xff] }
 0x435   :  { %v864_v46 = vadd.f32 %v863_v43, %v702_v39  ;;  %v2665_v39 = vld [vmem:[#allocation5 + $0x170] ss:$0 sm:$0xff] }
 0x436   :  { %v1020_v49 = vpop.f32.mrb[14].mxu0  ;;  %v1236_v43 = vld [vmem:[#allocation5 + $0x150] sm:$0xff] }
 0x437   :  { %v1025_v50 = vmul.f32 %v3246_v48, %v1020_v49  ;;  %v2907_v51 = vpop.f32.mrb[15].mxu0  ;;  %v2666_v48 = vld [vmem:[#allocation5 + $0xd8] ss:$0 sm:$0xff] }
 0x439   :  { %v1026_v52 = vadd.f32 %v1025_v50, %v864_v46  ;;  %v3161_v46 = vpack.c.bf16 %v1237_v44, %v1236_v43  ;;  %v2675_v44 = vld [vmem:[#allocation5 + $0x1f8] ss:$0 sm:$0xff] }
 0x43b   :  { %2917 = vmatmul.mubr.msk.f32.vlgmr.msra.gmra.mrb[8].mxu1 %vm143_vm2, %v1026_v52 }
 0x43c   :  { %2962 = vmatprep.mubr.msk.f32.mxu1 %vm3348_vm0, %v3349_v1  ;;  %3141 = vmatpush3.bf16.msra.mxu1 %v3140_v7 }
 0x43d   :  { %3142 = vmatprep.subr.bf16.mxu1 %v3347_v0 }
 0x440   :  { %3144 = vmatpush3.bf16.msra.mxu1 %v3143_v9 }
 0x441   :  { %3145 = vmatprep.subr.bf16.mxu1 %v3347_v0 }
 0x444   :  { %3147 = vmatpush3.bf16.msra.mxu1 %v3146_v12 }
 0x445   :  { %3148 = vmatprep.subr.bf16.mxu1 %v3347_v0 }
 0x448   :  { %3150 = vmatpush3.bf16.msra.mxu1 %v3149_v15 }
 0x449   :  { %3151 = vmatprep.subr.bf16.mxu1 %v3347_v0 }
 0x44c   :  { %3153 = vmatpush3.bf16.msra.mxu1 %v3152_v18  ;;  %v2670_v18 = vld [vmem:[#allocation5 + $0x180] ss:$0 sm:$0xff] }
 0x44d   :  { %3154 = vmatprep.subr.bf16.mxu1 %v3347_v0 }
 0x450   :  { %3156 = vmatpush3.bf16.msra.mxu1 %v3155_v21 }
 0x451   :  { %3157 = vmatprep.subr.bf16.mxu1 %v3347_v0 }
 0x454   :  { %3159 = vmatpush3.bf16.msra.mxu1 %v3158_v25  ;;  %v3173_v25 = vpack.c.bf16 %v1427_v24, %v1426_v22  ;;  %v2227_v22 = vld [vmem:[#allocation5 + $0x210] sm:$0xff]  ;;  %v2228_v24 = vld [vmem:[#allocation5 + $0x218] sm:$0xff] }
 0x455   :  { %3160 = vmatprep.subr.bf16.mxu1 %v3347_v0  ;;  %v3185_v47 = vpack.c.bf16 %v2228_v24, %v2227_v22 }
 0x458   :  { %3162 = vmatpush3.bf16.msra.mxu1 %v3161_v46 }
 0x459   :  { %3008 = vmatprep.subr.mxu1 %v3349_v1 }
 0x50e   :  { %v1105_v54 = vpop.f32.mrb[8].mxu1 }
 0x50f   :  { %v1106_v55 = vadd.f32 %v2662_v53, %v1105_v54  ;;  %v2918_v56 = vpop.f32.mrb[9].mxu1  ;;  %v2668_v53 = vld [vmem:[#allocation5 + $0x160] ss:$0 sm:$0xff] }
 0x511   :  { %v3519_v57 = vadd.f32 %v1106_v55, %v3410_v23  ;;  %v3137_v23 = vpack.c.bf16 %v1142_v3, %v1141_v2  ;;  %v1344_v2 = vld [vmem:[#allocation5 + $0x198] sm:$0xff]  ;;  %v1345_v3 = vld [vmem:[#allocation5 + $0x1a0] sm:$0xff] }
 0x513   :  { %v1112_v58 = vsel %vm143_vm2, %v3519_v57, 0.0  ;;  %v1117_v59 = vmul.f32 %v3519_v57, %v3519_v57  ;;  %3138 = vmatpush3.bf16.msra.mxu0 %v3137_v23  ;;  %v3167_v23 = vpack.c.bf16 %v1345_v3, %v1344_v2 }
 0x514   :  { %1113 = vadd.xlane.f32.xlu0 %v1112_v58  ;;  %3163 = vmatprep.subr.bf16.mxu0 %v3347_v0 }
 0x515   :  { %v1118_v60 = vsel %vm143_vm2, %v1117_v59, 0.0 }
 0x516   :  { %1119 = vadd.xlane.f32.xlu1 %v1118_v60 }
 0x5a1   :  { %v1114_v26 = vpop.xlane.xlu0 %1113 }
 0x5a2   :  { %v1116_v27 = vmul.f32 0.03125, %v1114_v26  ;;  %v1503_v26 = vld [vmem:[#allocation5 + $0x1d8] sm:$0xff] }
 0x5a3   :  { %v1120_v28 = vpop.xlane.xlu1 %1119 }
 0x5a4   :  { %v1122_v29 = vmul.f32 %v1116_v27, %v1116_v27  ;;  %v1121_v30 = vmul.f32 0.03125, %v1120_v28  ;;  %v1125_v35 = vsub.f32 %v3519_v57, %v1116_v27  ;;  %v1504_v27 = vld [vmem:[#allocation5 + $0x1e0] sm:$0xff] }
 0x5a5   :  { %v3176_v28 = vpack.c.bf16 %v1504_v27, %v1503_v26 }
 0x5a6   :  { %v1123_v31 = vsub.f32 %v1121_v30, %v1122_v29  ;;  %v1505_v29 = vld [vmem:[#allocation5 + $0x1e8] sm:$0xff]  ;;  %v1506_v30 = vld [vmem:[#allocation5 + $0x1f0] sm:$0xff] }
 0x5a8   :  { %v1124_v32 = vmax.f32 %v1123_v31, 0.0  ;;  %v3179_v31 = vpack.c.bf16 %v1506_v30, %v1505_v29 }
 0x5aa   :  { %v1126_v34 = vadd.f32 1e-05, %v1124_v32 }
 0x5ac   :  { %3247 = vrsqrt.f32 %v1126_v34 }
 0x5b6   :  { %v3248_v36 = vpop.eup %3247 }
 0x5b7   :  { %v1128_v38 = vmul.f32 %v3248_v36, %v1125_v35  ;;  %v2671_v35 = vld [vmem:[#allocation5 + $0x1a8] ss:$0 sm:$0xff]  ;;  %v2673_v36 = vld [vmem:[#allocation5 + $0x1d0] ss:$0 sm:$0xff] }
 0x5b9   :  { %v1133_v40 = vmul.f32 %v2664_v37, %v1128_v38 }
 0x5bb   :  { %v1138_v42 = vadd.f32 %v2665_v39, %v1133_v40 }
 0x5bd   :  { %2928 = vmatmul.mubr.msk.f32.vlgmr.msra.gmra.mrb[16].mxu0 %vm143_vm2, %v1138_v42 }
 0x5be   :  { %2973 = vmatprep.mubr.msk.f32.mxu0 %vm3348_vm0, %v3349_v1  ;;  %3165 = vmatpush3.bf16.msra.mxu0 %v3164_v63 }
 0x5bf   :  { %3166 = vmatprep.subr.bf16.mxu0 %v3347_v0 }
 0x5c2   :  { %3168 = vmatpush3.bf16.msra.mxu0 %v3167_v23 }
 0x5c3   :  { %3169 = vmatprep.subr.bf16.mxu0 %v3347_v0 }
 0x690   :  { %v1217_v49 = vpop.f32.mrb[16].mxu0 }
 0x691   :  { %v1218_v50 = vadd.f32 %v2666_v48, %v1217_v49  ;;  %v2929_v51 = vpop.f32.mrb[17].mxu0 }
 0x693   :  { %v1221_v52 = vmax.f32 %v1218_v50, 0.0 }
 0x695   :  { %2963 = vmatmul.mubr.f32.vlgmr.msra.gmra.mrb[10].mxu1 %v1221_v52 }
 0x696   :  { %3010 = vmatprep.mubr.msk.f32.mxu1 %vm3348_vm0, %v3349_v1 }
 0x768   :  { %v1309_v54 = vpop.f32.mrb[10].mxu1 }
 0x769   :  { %v1310_v55 = vadd.f32 %v2668_v53, %v1309_v54  ;;  %v2964_v56 = vpop.f32.mrb[11].mxu1 }
 0x76b   :  { %v1313_v57 = vadd.f32 %v1310_v55, %v1138_v42 }
 0x76d   :  { %v1316_v58 = vsel %vm143_vm2, %v1313_v57, 0.0  ;;  %v1320_v59 = vmul.f32 %v1313_v57, %v1313_v57 }
 0x76e   :  { %1317 = vadd.xlane.f32.xlu0 %v1316_v58 }
 0x76f   :  { %v1321_v60 = vsel %vm143_vm2, %v1320_v59, 0.0 }
 0x770   :  { %1322 = vadd.xlane.f32.xlu1 %v1321_v60 }
 0x7fb   :  { %v1318_v4 = vpop.xlane.xlu0 %1317 }
 0x7fc   :  { %v1319_v5 = vmul.f32 0.03125, %v1318_v4 }
 0x7fd   :  { %v1323_v6 = vpop.xlane.xlu1 %1322 }
 0x7fe   :  { %v1325_v7 = vmul.f32 %v1319_v5, %v1319_v5  ;;  %v1324_v8 = vmul.f32 0.03125, %v1323_v6  ;;  %v1328_v12 = vsub.f32 %v1313_v57, %v1319_v5 }
 0x800   :  { %v1326_v9 = vsub.f32 %v1324_v8, %v1325_v7 }
 0x802   :  { %v1327_v10 = vmax.f32 %v1326_v9, 0.0 }
 0x804   :  { %v1329_v11 = vadd.f32 1e-05, %v1327_v10 }
 0x806   :  { %3249 = vrsqrt.f32 %v1329_v11 }
 0x810   :  { %v3250_v13 = vpop.eup %3249 }
 0x811   :  { %v1331_v15 = vmul.f32 %v3250_v13, %v1328_v12 }
 0x813   :  { %v1336_v19 = vmul.f32 %v2669_v14, %v1331_v15 }
 0x815   :  { %v3546_v21 = vadd.f32 %v2670_v18, %v1336_v19  ;;  %v2226_v19 = vld [vmem:[#allocation5 + $0x208] sm:$0xff] }
 0x817   :  { %2974 = vmatmul.mubr.msk.f32.vlgmr.msra.gmra.mrb[18].mxu0 %vm143_vm2, %v3546_v21 }
 0x818   :  { %3171 = vmatpush3.bf16.msra.mxu0 %v3170_v20  ;;  %2984 = vmatprep.mubr.msk.f32.mxu0 %vm3348_vm0, %v3349_v1  ;;  %v3182_v20 = vpack.c.bf16 %v2226_v19, %v2225_v45  ;;  %v2432_v45 = vld [vmem:[#allocation5 + $0x2b8] sm:$0xff] }
 0x819   :  { %3172 = vmatprep.subr.bf16.mxu0 %v3347_v0 }
 0x81c   :  { %3174 = vmatpush3.bf16.msra.mxu0 %v3173_v25 }
 0x81d   :  { %3175 = vmatprep.subr.bf16.mxu0 %v3347_v0 }
 0x81f   :  { %2985 = vmatmul.mubr.msk.f32.vlgmr.msra.gmra.mrb[20].mxu0 %vm143_vm2, %v3546_v21 }
 0x820   :  { %3177 = vmatpush3.bf16.msra.mxu0 %v3176_v28  ;;  %2995 = vmatprep.mubr.msk.f32.mxu0 %vm3348_vm0, %v3349_v1 }
 0x821   :  { %3178 = vmatprep.subr.bf16.mxu0 %v3347_v0 }
 0x824   :  { %3180 = vmatpush3.bf16.msra.mxu0 %v3179_v31 }
 0x825   :  { %2998 = vmatprep.subr.mxu0 %v3349_v1 }
 0x827   :  { %2996 = vmatmul.mubr.msk.f32.vlgmr.msra.gmra.mrb[22].mxu0 %vm143_vm2, %v3546_v21 }
 0x828   :  { %3000 = vmatprep.mubr.msk.f32.mxu0 %vm3348_vm0, %v3349_v1 }
 0x8ea   :  { %v1420_v32 = vpop.f32.mrb[18].mxu0 }
 0x8eb   :  { %v2975_v34 = vpop.f32.mrb[19].mxu0  ;;  %v1421_v38 = vadd.f32 %v2671_v35, %v1420_v32 }
 0x8ed   :  { %v1582_v42 = vsel %vm41_vm5, %v1421_v38, 0.0  ;;  %v1745_v43 = vsel %vm3431_vm6, %v1421_v38, 0.0  ;;  %v1905_v50 = vsel %vm3449_vm9, %v1421_v38, 0.0  ;;  %v2065_v51 = vsel %vm3468_vm12, %v1421_v38, 0.0 }
 0x8f2   :  { %v1499_v37 = vpop.f32.mrb[20].mxu0 }
 0x8f3   :  { %v1500_v39 = vadd.f32 %v2673_v36, %v1499_v37  ;;  %v2986_v40 = vpop.f32.mrb[21].mxu0 }
 0x8f5   :  { %2999 = vmatpush3.xpose.msk.msra.mxu0 %vm143_vm2, %v1500_v39  ;;  %3009 = vmatpush3.xpose.msk.msra.mxu1 %vm143_vm2, %v1500_v39 }
 0x8f6   :  { %3018 = vmatprep.subr.mxu1 %v3349_v1  ;;  %3003 = vmatprep.subr.mxu0 %v3349_v1 }
 0x8f8   :  { %3001 = vmatmul.mubr.msk.f32.vlgmr.msra.gmra.mrb[24].mxu0 %vm143_vm2, %v1582_v42  ;;  %3011 = vmatmul.mubr.msk.f32.vlgmr.msra.gmra.mrb[12].mxu1 %vm143_vm2, %v1745_v43 }
 0x8f9   :  { %3019 = vmatpush3.xpose.msk.msra.mxu1 %vm143_vm2, %v1500_v39  ;;  %3020 = vmatprep.mubr.msk.f32.mxu1 %vm3348_vm0, %v3349_v1 }
 0x8fa   :  { %v1578_v46 = vpop.f32.mrb[22].mxu0  ;;  %3028 = vmatprep.subr.mxu1 %v3349_v1  ;;  %3005 = vmatprep.mubr.msk.f32.mxu0 %vm3348_vm0, %v3349_v1 }
 0x8fb   :  { %v3580_v48 = vadd.f32 %v2675_v44, %v1578_v46  ;;  %v2997_v49 = vpop.f32.mrb[23].mxu0 }
 0x8fc   :  { %3021 = vmatmul.mubr.msk.f32.vlgmr.msra.gmra.mrb[14].mxu1 %vm143_vm2, %v1905_v50 }
 0x8fd   :  { %3004 = vmatpush3.msk.msra.mxu0 %vm41_vm5, %v3580_v48  ;;  %3029 = vmatpush3.xpose.msk.msra.mxu1 %vm143_vm2, %v1500_v39 }
 0x8fe   :  { %3030 = vmatprep.mubr.msk.f32.mxu1 %vm3348_vm0, %v3349_v1  ;;  %3013 = vmatprep.subr.mxu0 %v3349_v1 }
 0x8ff   :  { %3181 = vmatprep.subr.bf16.mxu1 %v3347_v0 }
 0x900   :  { %3031 = vmatmul.mubr.msk.f32.vlgmr.msra.gmra.mrb[16].mxu1 %vm143_vm2, %v2065_v51 }
 0x901   :  { %3046 = vmatprep.mubr.msk.f32.mxu1 %vm3348_vm0, %v3349_v1  ;;  %3183 = vmatpush3.bf16.msra.mxu1 %v3182_v20 }
 0x902   :  { %3184 = vmatprep.subr.bf16.mxu1 %v3347_v0 }
 0x905   :  { %3186 = vmatpush3.bf16.msra.mxu1 %v3185_v47 }
 0x906   :  { %3193 = vmatprep.subr.bf16.mxu1 %v3347_v0 }
 0x9cb   :  { %v1656_v52 = vpop.f32.mrb[24].mxu0  ;;  %v1816_v33 = vpop.f32.mrb[12].mxu1 }
 0x9cc   :  { %v3002_v53 = vpop.f32.mrb[25].mxu0  ;;  %v3012_v54 = vpop.f32.mrb[13].mxu1  ;;  %v1820_v55 = vsel %vm455_vm13, %v1816_v33, -inf  ;;  %v1660_v56 = vsel %vm455_vm13, %v1656_v52, -inf }
 0x9cd   :  { %1821 = vmax.xlane.f32.xlu1 %v1820_v55  ;;  %1661 = vmax.xlane.f32.xlu0 %v1660_v56 }
 0x9cf   :  { %v1976_v57 = vpop.f32.mrb[14].mxu1 }
 0x9d0   :  { %v3022_v58 = vpop.f32.mrb[15].mxu1  ;;  %v1980_v59 = vsel %vm455_vm13, %v1976_v57, -inf }
 0x9d1   :  { %1981 = vmax.xlane.f32.xlu0 %v1980_v59  ;;  %v2336_v59 = vld [vmem:[#allocation5 + $0x228] sm:$0xff] }
 0x9d3   :  { %v2136_v60 = vpop.f32.mrb[16].mxu1 }
 0x9d4   :  { %v3032_v61 = vpop.f32.mrb[17].mxu1  ;;  %v2140_v62 = vsel %vm455_vm13, %v2136_v60, -inf }
 0x9d5   :  { %2141 = vmax.xlane.f32.xlu1 %v2140_v62  ;;  %v2338_v62 = vld [vmem:[#allocation5 + $0x238] sm:$0xff] }
 0xa5a   :  { %v1822_v63 = vpop.xlane.xlu1 %1821  ;;  %v1662_v2 = vpop.xlane.xlu0 %1661 }
 0xa5b   :  { %v1823_v3 = vsub.f32 %v1816_v33, %v1822_v63  ;;  %v1663_v23 = vsub.f32 %v1656_v52, %v1662_v2  ;;  %v2693_v52 = vld [vmem:[#allocation5 + $0x220] ss:$0 sm:$0xff]  ;;  %v2419_v2 = vld [vmem:[#allocation5 + $0x250] sm:$0xff] }
 0xa5c   :  { %v2339_v63 = vld [vmem:[#allocation5 + $0x240] sm:$0xff] }
 0xa5d   :  { %v1824_v4 = vmul.f32 1.442695, %v1823_v3  ;;  %v1664_v5 = vmul.f32 1.442695, %v1663_v23  ;;  %v2420_v3 = vld [vmem:[#allocation5 + $0x258] sm:$0xff]  ;;  %v2421_v23 = vld [vmem:[#allocation5 + $0x260] sm:$0xff] }
 0xa5e   :  { %v1982_v6 = vpop.xlane.xlu0 %1981 }
 0xa5f   :  { %3251 = vpow2.f32 %v1824_v4  ;;  %v1983_v7 = vsub.f32 %v1976_v57, %v1982_v6  ;;  %v3194_v4 = vpack.c.bf16 %v2420_v3, %v2419_v2 }
 0xa60   :  { %3253 = vpow2.f32 %v1664_v5  ;;  %v2422_v5 = vld [vmem:[#allocation5 + $0x268] sm:$0xff] }
 0xa61   :  { %v1984_v8 = vmul.f32 1.442695, %v1983_v7  ;;  %v3197_v6 = vpack.c.bf16 %v2422_v5, %v2421_v23  ;;  %v2423_v7 = vld [vmem:[#allocation5 + $0x270] sm:$0xff] }
 0xa62   :  { %v2142_v9 = vpop.xlane.xlu1 %2141 }
 0xa63   :  { %3255 = vpow2.f32 %v1984_v8  ;;  %v2143_v10 = vsub.f32 %v2136_v60, %v2142_v9  ;;  %v2337_v60 = vld [vmem:[#allocation5 + $0x230] sm:$0xff]  ;;  %v2424_v8 = vld [vmem:[#allocation5 + $0x278] sm:$0xff] }
 0xa64   :  { %v3188_v61 = vpack.c.bf16 %v2337_v60, %v2336_v59  ;;  %v3200_v9 = vpack.c.bf16 %v2424_v8, %v2423_v7  ;;  %v2701_v8 = vld [vmem:[#allocation5 + $0x2f0] ss:$0 sm:$0xff] }
 0xa65   :  { %v2144_v11 = vmul.f32 1.442695, %v2143_v10  ;;  %v2425_v10 = vld [vmem:[#allocation5 + $0x280] sm:$0xff] }
 0xa67   :  { %3257 = vpow2.f32 %v2144_v11  ;;  %v2426_v11 = vld [vmem:[#allocation5 + $0x288] sm:$0xff] }
 0xa69   :  { %v3252_v12 = vpop.eup %3251 }
 0xa6a   :  { %v3254_v13 = vpop.eup %3253  ;;  %v1826_v14 = vsel %vm455_vm13, %v3252_v12, 0.0 }
 0xa6b   :  { %3006 = vmatmul.mubr.msk.f32.vlgmr.msra.gmra.mrb[26].mxu0 %vm455_vm13, %v3254_v13  ;;  %1827 = vadd.xlane.f32.xlu1 %v1826_v14  ;;  %v1666_v15 = vsel %vm455_vm13, %v3254_v13, 0.0  ;;  %v2427_v13 = vld [vmem:[#allocation5 + $0x290] sm:$0xff]  ;;  %v2428_v14 = vld [vmem:[#allocation5 + $0x298] sm:$0xff] }
 0xa6c   :  { %3014 = vmatpush3.msk.msra.mxu0 %vm3431_vm6, %v3580_v48  ;;  %1667 = vadd.xlane.f32.xlu0 %v1666_v15  ;;  %v3206_v15 = vpack.c.bf16 %v2428_v14, %v2427_v13 }
 0xa6d   :  { %v3256_v16 = vpop.eup %3255  ;;  %3015 = vmatprep.mubr.msk.f32.mxu0 %vm3348_vm0, %v3349_v1  ;;  %3023 = vmatprep.subr.mxu0 %v3349_v1 }
 0xa6e   :  { %v1986_v17 = vsel %vm455_vm13, %v3256_v16, 0.0 }
 0xa6f   :  { %3016 = vmatmul.mubr.msk.f32.vlgmr.msra.gmra.mrb[28].mxu0 %vm455_vm13, %v3252_v12  ;;  %v3203_v12 = vpack.c.bf16 %v2426_v11, %v2425_v10 }
 0xa70   :  { %3024 = vmatpush3.msk.msra.mxu0 %vm3449_vm9, %v3580_v48  ;;  %1987 = vadd.xlane.f32.xlu0 %v1986_v17  ;;  %v2430_v17 = vld [vmem:[#allocation5 + $0x2a8] sm:$0xff] }
 0xa71   :  { %v3258_v18 = vpop.eup %3257  ;;  %3025 = vmatprep.mubr.msk.f32.mxu0 %vm3348_vm0, %v3349_v1  ;;  %3033 = vmatprep.subr.mxu0 %v3349_v1 }
 0xa72   :  { %v2146_v41 = vsel %vm455_vm13, %v3258_v18, 0.0 }
 0xa73   :  { %3026 = vmatmul.mubr.msk.f32.vlgmr.msra.gmra.mrb[30].mxu0 %vm455_vm13, %v3256_v16  ;;  %2147 = vadd.xlane.f32.xlu1 %v2146_v41  ;;  %v2429_v16 = vld [vmem:[#allocation5 + $0x2a0] sm:$0xff]  ;;  %v2431_v41 = vld [vmem:[#allocation5 + $0x2b0] sm:$0xff] }
 0xa74   :  { %3034 = vmatpush3.msk.msra.mxu0 %vm3468_vm12, %v3580_v48  ;;  %3035 = vmatprep.mubr.msk.f32.mxu0 %vm3348_vm0, %v3349_v1  ;;  %v3212_v19 = vpack.c.bf16 %v2432_v45, %v2431_v41 }
 0xa75   :  { %3187 = vmatprep.subr.bf16.mxu0 %v3347_v0 }
 0xa77   :  { %3036 = vmatmul.mubr.msk.f32.vlgmr.msra.gmra.mrb[32].mxu0 %vm455_vm13, %v3258_v18  ;;  %v3209_v18 = vpack.c.bf16 %v2430_v17, %v2429_v16 }
 0xa78   :  { %3057 = vmatprep.mubr.msk.f32.mxu0 %vm3348_vm0, %v3349_v1  ;;  %3189 = vmatpush3.bf16.msra.mxu0 %v3188_v61 }
 0xa79   :  { %3190 = vmatprep.subr.bf16.mxu0 %v3347_v0 }
 0xaf8   :  { %v1828_v26 = vpop.xlane.xlu1 %1827 }
 0xaf9   :  { %v1668_v25 = vpop.xlane.xlu0 %1667  ;;  %3259 = vrcp.f32 %v1828_v26 }
 0xafa   :  { %3261 = vrcp.f32 %v1668_v25 }
 0xafd   :  { %v1988_v27 = vpop.xlane.xlu0 %1987 }
 0xafe   :  { %3263 = vrcp.f32 %v1988_v27 }
 0xb00   :  { %v2148_v28 = vpop.xlane.xlu1 %2147 }
 0xb01   :  { %3265 = vrcp.f32 %v2148_v28 }
 0xb03   :  { %v3260_v31 = vpop.eup %3259 }
 0xb04   :  { %v3262_v32 = vpop.eup %3261 }
 0xb08   :  { %v3264_v39 = vpop.eup %3263 }
 0xb0b   :  { %v3266_v46 = vpop.eup %3265 }
 0xb3e   :  { %v1738_v29 = vpop.f32.mrb[26].mxu0 }
 0xb3f   :  { %v3007_v30 = vpop.f32.mrb[27].mxu0  ;;  %v1743_v35 = vmul.f32 %v3262_v32, %v1738_v29 }
 0xb42   :  { %v1898_v34 = vpop.f32.mrb[28].mxu0 }
 0xb43   :  { %v1903_v36 = vmul.f32 %v3260_v31, %v1898_v34  ;;  %v3017_v37 = vpop.f32.mrb[29].mxu0  ;;  %v2695_v31 = vld [vmem:[#allocation5 + $0x2d8] ss:$0 sm:$0xff]  ;;  %v2696_v34 = vld [vmem:[#allocation5 + $0x2e0] ss:$0 sm:$0xff] }
 0xb44   :  { %v2433_v37 = vld [vmem:[#allocation5 + $0x2c0] sm:$0xff] }
 0xb45   :  { %v1904_v38 = vadd.f32 %v1903_v36, %v1743_v35 }
 0xb46   :  { %v2058_v40 = vpop.f32.mrb[30].mxu0 }
 0xb47   :  { %v2063_v42 = vmul.f32 %v3264_v39, %v2058_v40  ;;  %v3027_v43 = vpop.f32.mrb[31].mxu0  ;;  %v2697_v40 = vld [vmem:[#allocation5 + $0x248] ss:$0 sm:$0xff] }
 0xb49   :  { %v2064_v44 = vadd.f32 %v2063_v42, %v1904_v38  ;;  %v2434_v38 = vld [vmem:[#allocation5 + $0x2c8] sm:$0xff] }
 0xb4a   :  { %v2218_v48 = vpop.f32.mrb[32].mxu0  ;;  %v3215_v39 = vpack.c.bf16 %v2434_v38, %v2433_v37 }
 0xb4b   :  { %v2223_v49 = vmul.f32 %v3266_v46, %v2218_v48  ;;  %v3037_v50 = vpop.f32.mrb[33].mxu0  ;;  %v2699_v48 = vld [vmem:[#allocation5 + $0x2d0] ss:$0 sm:$0xff] }
 0xb4d   :  { %v2224_v51 = vadd.f32 %v2223_v49, %v2064_v44 }
 0xb4f   :  { %3047 = vmatmul.mubr.msk.f32.vlgmr.msra.gmra.mrb[18].mxu1 %vm143_vm2, %v2224_v51 }
 0xb50   :  { %3092 = vmatprep.mubr.msk.f32.mxu1 %vm3348_vm0, %v3349_v1  ;;  %3195 = vmatpush3.bf16.msra.mxu1 %v3194_v4 }
 0xb51   :  { %3196 = vmatprep.subr.bf16.mxu1 %v3347_v0 }
 0xb54   :  { %3198 = vmatpush3.bf16.msra.mxu1 %v3197_v6  ;;  %v2700_v6 = vld [vmem:[#allocation5 + $0x2e8] ss:$0 sm:$0xff] }
 0xb55   :  { %3199 = vmatprep.subr.bf16.mxu1 %v3347_v0 }
 0xb58   :  { %3201 = vmatpush3.bf16.msra.mxu1 %v3200_v9 }
 0xb59   :  { %3202 = vmatprep.subr.bf16.mxu1 %v3347_v0 }
 0xb5c   :  { %3204 = vmatpush3.bf16.msra.mxu1 %v3203_v12 }
 0xb5d   :  { %3205 = vmatprep.subr.bf16.mxu1 %v3347_v0 }
 0xb60   :  { %3207 = vmatpush3.bf16.msra.mxu1 %v3206_v15 }
 0xb61   :  { %3208 = vmatprep.subr.bf16.mxu1 %v3347_v0 }
 0xb64   :  { %3210 = vmatpush3.bf16.msra.mxu1 %v3209_v18 }
 0xb65   :  { %3211 = vmatprep.subr.bf16.mxu1 %v3347_v0 }
 0xb68   :  { %3213 = vmatpush3.bf16.msra.mxu1 %v3212_v19 }
 0xb69   :  { %3214 = vmatprep.subr.bf16.mxu1 %v3347_v0 }
 0xb6c   :  { %3216 = vmatpush3.bf16.msra.mxu1 %v3215_v39 }
 0xc22   :  { %v2303_v33 = vpop.f32.mrb[18].mxu1 }
 0xc23   :  { %v2304_v53 = vadd.f32 %v2693_v52, %v2303_v33  ;;  %v3048_v54 = vpop.f32.mrb[19].mxu1 }
 0xc24   :  { %v2539_v54 = vld [vmem:[#allocation5 + $0x2f8] sm:$0xff] }
 0xc25   :  { %v3636_v55 = vadd.f32 %v2304_v53, %v3546_v21  ;;  %v3191_v21 = vpack.c.bf16 %v2339_v63, %v2338_v62 }
 0xc27   :  { %v2310_v56 = vsel %vm143_vm2, %v3636_v55, 0.0  ;;  %v2314_v57 = vmul.f32 %v3636_v55, %v3636_v55  ;;  %3192 = vmatpush3.bf16.msra.mxu0 %v3191_v21 }
 0xc28   :  { %2311 = vadd.xlane.f32.xlu0 %v2310_v56  ;;  %3217 = vmatprep.subr.bf16.mxu0 %v3347_v0 }
 0xc29   :  { %v2315_v58 = vsel %vm143_vm2, %v2314_v57, 0.0  ;;  %v2541_v57 = vld [vmem:[#allocation5 + $0x308] sm:$0xff] }
 0xc2a   :  { %2316 = vadd.xlane.f32.xlu1 %v2315_v58  ;;  %v2542_v58 = vld [vmem:[#allocation5 + $0x310] sm:$0xff] }
 0xc2b   :  { %v3221_v59 = vpack.c.bf16 %v2542_v58, %v2541_v57 }
 0xcb5   :  { %v2312_v20 = vpop.xlane.xlu0 %2311 }
 0xcb6   :  { %v2313_v22 = vmul.f32 0.03125, %v2312_v20 }
 0xcb7   :  { %v2317_v24 = vpop.xlane.xlu1 %2316 }
 0xcb8   :  { %v2319_v47 = vmul.f32 %v2313_v22, %v2313_v22  ;;  %v2318_v25 = vmul.f32 0.03125, %v2317_v24  ;;  %v2322_v29 = vsub.f32 %v3636_v55, %v2313_v22  ;;  %v2540_v55 = vld [vmem:[#allocation5 + $0x300] sm:$0xff] }
 0xcb9   :  { %v3218_v56 = vpack.c.bf16 %v2540_v55, %v2539_v54 }
 0xcba   :  { %v2320_v26 = vsub.f32 %v2318_v25, %v2319_v47 }
 0xcbc   :  { %v2321_v27 = vmax.f32 %v2320_v26, 0.0 }
 0xcbe   :  { %v2323_v28 = vadd.f32 1e-05, %v2321_v27 }
 0xcc0   :  { %3267 = vrsqrt.f32 %v2323_v28 }
 0xcca   :  { %v3268_v30 = vpop.eup %3267 }
 0xccb   :  { %v2325_v32 = vmul.f32 %v3268_v30, %v2322_v29 }
 0xccd   :  { %v2330_v35 = vmul.f32 %v2695_v31, %v2325_v32 }
 0xccf   :  { %v2335_v36 = vadd.f32 %v2696_v34, %v2330_v35 }
 0xcd1   :  { %3058 = vmatmul.mubr.msk.f32.vlgmr.msra.gmra.mrb[34].mxu0 %vm143_vm2, %v2335_v36 }
 0xcd2   :  { %3103 = vmatprep.mubr.msk.f32.mxu0 %vm3348_vm0, %v3349_v1  ;;  %3219 = vmatpush3.bf16.msra.mxu0 %v3218_v56 }
 0xcd3   :  { %3220 = vmatprep.subr.bf16.mxu0 %v3347_v0  ;;  %v2702_v0 = vld [vmem:[#allocation5 + $0x318] ss:$0 sm:$0xff] }
 0xcd6   :  { %3222 = vmatpush3.bf16.msra.mxu0 %v3221_v59 }
 0xda4   :  { %v2414_v42 = vpop.f32.mrb[34].mxu0 }
 0xda5   :  { %v2415_v43 = vadd.f32 %v2697_v40, %v2414_v42  ;;  %v3059_v44 = vpop.f32.mrb[35].mxu0 }
 0xda7   :  { %v2418_v46 = vmax.f32 %v2415_v43, 0.0 }
 0xda9   :  { %3093 = vmatmul.mubr.f32.vlgmr.msra.gmra.mrb[20].mxu1 %v2418_v46 }
 0xe7c   :  { %v2506_v49 = vpop.f32.mrb[20].mxu1 }
 0xe7d   :  { %v2507_v50 = vadd.f32 %v2699_v48, %v2506_v49  ;;  %v3094_v51 = vpop.f32.mrb[21].mxu1 }
 0xe7f   :  { %v2510_v52 = vadd.f32 %v2507_v50, %v2335_v36 }
 0xe81   :  { %v2513_v33 = vsel %vm143_vm2, %v2510_v52, 0.0  ;;  %v2517_v53 = vmul.f32 %v2510_v52, %v2510_v52 }
 0xe82   :  { %2514 = vadd.xlane.f32.xlu0 %v2513_v33 }
 0xe83   :  { %v2518_v1 = vsel %vm143_vm2, %v2517_v53, 0.0 }
 0xe84   :  { %2519 = vadd.xlane.f32.xlu1 %v2518_v1 }
 0xf0f   :  { %v2515_v60 = vpop.xlane.xlu0 %2514 }
 0xf10   :  { %v2516_v61 = vmul.f32 0.03125, %v2515_v60 }
 0xf11   :  { %v2520_v62 = vpop.xlane.xlu1 %2519 }
 0xf12   :  { %v2522_v63 = vmul.f32 %v2516_v61, %v2516_v61  ;;  %v2521_v21 = vmul.f32 0.03125, %v2520_v62  ;;  %v2525_v4 = vsub.f32 %v2510_v52, %v2516_v61 }
 0xf14   :  { %v2523_v2 = vsub.f32 %v2521_v21, %v2522_v63 }
 0xf16   :  { %v2524_v3 = vmax.f32 %v2523_v2, 0.0 }
 0xf18   :  { %v2526_v23 = vadd.f32 1e-05, %v2524_v3 }
 0xf1a   :  { %3269 = vrsqrt.f32 %v2526_v23 }
 0xf24   :  { %v3270_v5 = vpop.eup %3269 }
 0xf25   :  { %v2528_v7 = vmul.f32 %v3270_v5, %v2525_v4 }
 0xf27   :  { %v2533_v9 = vmul.f32 %v2700_v6, %v2528_v7 }
 0xf29   :  { %v2538_v10 = vadd.f32 %v2701_v8, %v2533_v9 }
 0xf2b   :  { %3104 = vmatmul.mubr.msk.f32.vlgmr.msra.gmra.mrb[36].mxu0 %vm143_vm2, %v2538_v10 }
 0xffe   :  { %v2617_v11 = vpop.f32.mrb[36].mxu0 }
 0xfff   :  { %v2618_v12 = vadd.f32 %v2702_v0, %v2617_v11  ;;  %v3105_v13 = vpop.f32.mrb[37].mxu0 }
0x1001   :  { %2621 = vst.msk [vmem:[#allocation7] sm:$0xff] %vm455_vm13, %v2618_v12 }
0x1002   :  { %3326 = shalt.err (!%p3323_p6)
}
0x1003   :  { %s3327_s10 = scalar_lea.hbm %s3675_s2, 128 }
0x1004   :  { %p3328_p7 = scmp.ne.s32.totalorder %s3675_s2, %s3327_s10  ;;  %p3331_p8 = scmp.lt.u32.totalorder %s3327_s10, %s3675_s2 }
0x1006   :  { %p3333_p9 = pnand %p3331_p8, %p3328_p7 }
0x1008   :  { %3336 = shalt.err (!%p3333_p9)
}
0x1009   :  { %2631 = dma.vmem_to_hbm [thread:$0]  %s2629_s6, 128, %s3675_s2, [#allocation4]  }
0x100a   :  { %3341 = dma.done.wait [#allocation4], 128  }
0x100b   :  { %3342 = vsyncadd [#allocation4], 4294967168 }
0x100c   :  { %2635 = vsyncpa [#allocation3], 1 }
0x100d   :  { %2636 = vsyncpa [#allocation6], 1 }
0x100e   :  { %2637 = vsyncpa [#allocation4], 1 }

</bundles_post_ra>
